<compile_context>
chip_gen: v6e
topology: v6e:2x2x1
jax: 0.10.0
libtpu: 0.0.40
codegen_flags: <defaults>
</compile_context>

<pallas_src>
import functools

import jax
import jax.numpy as jnp
from jax import lax
from jax.experimental import pallas as pl
from jax.experimental.pallas import tpu as pltpu

EPS = 1e-5  # nn.BatchNorm2d / nn.LayerNorm default eps


# ----------------------------------------------------------------------------
# small helpers
# ----------------------------------------------------------------------------
def _gelu(x):
    # exact GELU (PyTorch nn.GELU() default, approximate='none')
    return 0.5 * x * (1.0 + lax.erf(x * 0.7071067811865476))


def _round_up(v, m):
    return ((v + m - 1) // m) * m


def _pad_to(a, shape):
    return jnp.pad(a, [(0, t - s) for s, t in zip(a.shape, shape)])


def _pick_bt(b):
    # prefer >= 2 steps on the batch grid axis (megacore sharding on v7x),
    # with bt <= 8; fall back to the largest divisor <= 8, then 1.
    for bt in (8, 4, 2, 1):
        if b % bt == 0 and b // bt >= 2:
            return bt
    for bt in (8, 4, 2, 1):
        if b % bt == 0:
            return bt
    return 1


# ----------------------------------------------------------------------------
# Kernel 1: im2col conv + folded BatchNorm + GELU (stem stages 1 and 2)
# ----------------------------------------------------------------------------
def _conv_kernel(p_ref, w_ref, scale_ref, shift_ref, o_ref, *, use_act):
    y = jnp.dot(p_ref[...], w_ref[...], preferred_element_type=jnp.float32)
    y = y * scale_ref[...] + shift_ref[...]
    if use_act:
        y = _gelu(y)
    o_ref[...] = y.astype(o_ref.dtype)


def conv_bn_act(patches, w_bf16, scale, shift, use_act=True):
    m, k = patches.shape
    n = w_bf16.shape[1]
    # keep tiles large (512) when M allows; pad M up instead of shrinking tiles
    tm = 512 if m >= 512 else _round_up(m, 8)
    m_pad = _round_up(m, tm)
    if m_pad != m:
        patches = jnp.pad(patches, ((0, m_pad - m), (0, 0)))
    out = pl.pallas_call(
        functools.partial(_conv_kernel, use_act=use_act),
        out_shape=jax.ShapeDtypeStruct((m_pad, n), jnp.bfloat16),
        grid=(m_pad // tm,),
        in_specs=[
            pl.BlockSpec((tm, k), lambda i: (i, 0)),
            pl.BlockSpec((k, n), lambda i: (0, 0)),
            pl.BlockSpec((1, n), lambda i: (0, 0)),
            pl.BlockSpec((1, n), lambda i: (0, 0)),
        ],
        out_specs=pl.BlockSpec((tm, n), lambda i: (i, 0)),
        compiler_params=pltpu.CompilerParams(dimension_semantics=("parallel",)),
    )(patches, w_bf16, scale, shift)
    return out[:m]


# ----------------------------------------------------------------------------
# Kernel 2: fused patch-projection + pos/cls + encoder stack + LN + classifier
#           grid = (batch tiles [parallel], transformer layers [arbitrary])
# ----------------------------------------------------------------------------
def _fused_vit_kernel(patches_ref, w3_ref, b3_ref, pos_ref, cls_ref,
                      ln1g_ref, ln1b_ref, wqkv_ref, bqkv_ref, wo_ref, bo_ref,
                      ln2g_ref, ln2b_ref, w1_ref, b1_ref, w2_ref, b2_ref,
                      postg_ref, postb_ref, wc_ref, bc_ref,
                      out_ref, x_ref,
                      *, num_heads, d_true, n_patches, s_true, s_pad, bt):
    f32, bf16 = jnp.float32, jnp.bfloat16
    dp = w3_ref.shape[1]                       # lane-padded embed dim
    k3 = w3_ref.shape[0]
    hd = d_true // num_heads
    scale = float(hd) ** -0.5
    m = bt * s_pad
    inv_d = 1.0 / float(d_true)
    l = pl.program_id(1)

    # tiny lane / token masks (cheap per-step VPU work)
    lane = lax.broadcasted_iota(jnp.int32, (1, dp), 1)
    dmask = (lane < d_true).astype(f32)                         # (1, dp)
    head_masks = [((lane >= h * hd) & (lane < (h + 1) * hd)).astype(f32)
                  for h in range(num_heads)]
    col = lax.broadcasted_iota(jnp.int32, (1, 1, s_pad), 2)
    col_bias = jnp.where(col < s_true, 0.0, -1e30).astype(f32)  # (1,1,s_pad)
    row = lax.broadcasted_iota(jnp.int32, (1, s_pad, 1), 1)
    row_valid = (row < s_true).astype(f32)                      # (1,s_pad,1)

    def layer_norm(v, g, b):
        # centered two-pass form; padded lanes are masked so statistics are
        # exact over the true feature width and padded lanes stay zero
        mu = jnp.sum(v, axis=-1, keepdims=True) * inv_d
        xc = (v - mu) * dmask
        var = jnp.sum(xc * xc, axis=-1, keepdims=True) * inv_d
        return xc * lax.rsqrt(var + EPS) * g + b

    # ---- patch embedding (single fused matmul) + pos embed + cls (l == 0) ----
    @pl.when(l == 0)
    def _init():
        pe = jnp.dot(patches_ref[...].reshape(bt * n_patches, k3), w3_ref[...],
                     preferred_element_type=f32) + b3_ref[...]
        pe = pe.reshape(bt, n_patches, dp) + pos_ref[...][None]
        parts = [jnp.broadcast_to(cls_ref[...].reshape(1, 1, dp), (bt, 1, dp)), pe]
        if s_pad > s_true:
            parts.append(jnp.zeros((bt, s_pad - s_true, dp), f32))
        x_ref[...] = jnp.concatenate(parts, axis=1)

    # ---- one pre-norm transformer encoder layer (weights streamed per step) --
    xm = x_ref[...].reshape(m, dp)
    xn = layer_norm(xm, ln1g_ref[0], ln1b_ref[0])
    qkv = jnp.dot(xn.astype(bf16), wqkv_ref[0],
                  preferred_element_type=f32) + bqkv_ref[0]
    q = (qkv[:, 0:dp] * scale).reshape(bt, s_pad, dp)
    k = qkv[:, dp:2 * dp].reshape(bt, s_pad, dp)
    v = qkv[:, 2 * dp:3 * dp].reshape(bt, s_pad, dp)

    ctx = jnp.zeros((bt, s_pad, dp), f32)
    for h in range(num_heads):
        hm = head_masks[h]
        s = jnp.einsum('bqd,bkd->bqk', q.astype(bf16), (k * hm).astype(bf16),
                       preferred_element_type=f32)
        s = s + col_bias
        s = s - jnp.max(s, axis=-1, keepdims=True)
        p = jnp.exp(s)
        p = p * pl.reciprocal(jnp.sum(p, axis=-1, keepdims=True), approx=True)
        ctx = ctx + jnp.einsum('bqk,bkd->bqd', p.astype(bf16),
                               (v * hm).astype(bf16),
                               preferred_element_type=f32)

    attn = jnp.dot(ctx.reshape(m, dp).astype(bf16), wo_ref[0],
                   preferred_element_type=f32) + bo_ref[0]
    x1 = xm + attn

    xn2 = layer_norm(x1, ln2g_ref[0], ln2b_ref[0])
    h1 = _gelu(jnp.dot(xn2.astype(bf16), w1_ref[0],
                       preferred_element_type=f32) + b1_ref[0])
    y = jnp.dot(h1.astype(bf16), w2_ref[0],
                preferred_element_type=f32) + b2_ref[0]
    xo = ((x1 + y).reshape(bt, s_pad, dp)) * row_valid
    x_ref[...] = xo

    # ---- post_transformer_norm + classifier, cls rows only (l == last) -------
    @pl.when(l == pl.num_programs(1) - 1)
    def _final():
        cls_rows = xo[:, 0, :]                                  # (bt, dp)
        if bt < 8:
            cls_rows = jnp.concatenate(
                [cls_rows, jnp.zeros((8 - bt, dp), f32)], axis=0)
        cls_n = layer_norm(cls_rows, postg_ref[...], postb_ref[...])
        logits = jnp.dot(cls_n.astype(bf16), wc_ref[...],
                         preferred_element_type=f32) + bc_ref[...]
        out_ref[...] = logits.reshape(1, 8, logits.shape[-1])


def fused_transformer(patches3, w3, b3, pos, cls, stacks, post_g, post_b, wc, bc,
                      *, num_heads, d_true, n_patches, n_layers, bt):
    b_full = patches3.shape[0]
    k3 = patches3.shape[-1]
    dp = w3.shape[1]
    fp = stacks["w1"].shape[-1]
    cp = wc.shape[1]
    s_true = n_patches + 1
    s_pad = _round_up(s_true, 8)
    nbt = b_full // bt

    def const(shape):
        return pl.BlockSpec(shape, lambda i, l: (0,) * len(shape))

    def per_layer(shape):                      # shape excludes leading layer axis
        nd = len(shape)
        return pl.BlockSpec((1,) + shape, lambda i, l: (l,) + (0,) * nd)

    kernel = functools.partial(
        _fused_vit_kernel, num_heads=num_heads, d_true=d_true,
        n_patches=n_patches, s_true=s_true, s_pad=s_pad, bt=bt)

    # rough VMEM budget: resident x + double-buffered one-layer weights +
    # constants + attention intermediates; 2x headroom, clamped to [16, 64] MiB
    per_layer_bytes = 2 * (dp * 3 * dp + dp * dp + 2 * dp * fp) + 4 * (6 * dp + fp)
    const_bytes = (2 * (k3 * dp + dp * cp) + 4 * (n_patches + 8) * dp
                   + 2 * bt * n_patches * k3)
    act_bytes = 4 * bt * s_pad * dp * 8 + 4 * bt * s_pad * s_pad * 4
    est = 2 * per_layer_bytes + 2 * const_bytes + act_bytes
    vmem_limit = int(min(64 * 2 ** 20, max(16 * 2 ** 20, 2 * est)))

    return pl.pallas_call(
        kernel,
        out_shape=jax.ShapeDtypeStruct((nbt, 8, cp), jnp.float32),
        grid=(nbt, n_layers),
        in_specs=[
            pl.BlockSpec((bt, n_patches, k3), lambda i, l: (i, 0, 0)),
            const((k3, dp)), const((1, dp)),
            const((n_patches, dp)), const((1, dp)),
            per_layer((1, dp)), per_layer((1, dp)),
            per_layer((dp, 3 * dp)), per_layer((1, 3 * dp)),
            per_layer((dp, dp)), per_layer((1, dp)),
            per_layer((1, dp)), per_layer((1, dp)),
            per_layer((dp, fp)), per_layer((1, fp)),
            per_layer((fp, dp)), per_layer((1, dp)),
            const((1, dp)), const((1, dp)),
            const((dp, cp)), const((1, cp)),
        ],
        out_specs=pl.BlockSpec((1, 8, cp), lambda i, l: (i, 0, 0)),
        scratch_shapes=[pltpu.VMEM((bt, s_pad, dp), jnp.float32)],
        compiler_params=pltpu.CompilerParams(
            dimension_semantics=("parallel", "arbitrary"),
            vmem_limit_bytes=vmem_limit),
    )(patches3, w3, b3, pos, cls,
      stacks["ln1_g"], stacks["ln1_b"], stacks["wqkv"], stacks["bqkv"],
      stacks["wo"], stacks["bo"], stacks["ln2_g"], stacks["ln2_b"],
      stacks["w1"], stacks["b1"], stacks["w2"], stacks["b2"],
      post_g, post_b, wc, bc)


# ----------------------------------------------------------------------------
# im2col patch extraction (stride == kernel for all three stem convs)
# ----------------------------------------------------------------------------
def patchify_nchw(x, k, s, p):
    b, c, h, w = x.shape
    if p:
        x = jnp.pad(x, ((0, 0), (0, 0), (p, p), (p, p)))
    hp, wp = x.shape[2], x.shape[3]
    nh = (hp - k) // s + 1
    nw = (wp - k) // s + 1
    x = x[:, :, :nh * s, :nw * s]
    x = x.reshape(b, c, nh, k, nw, k)
    x = x.transpose(0, 2, 4, 1, 3, 5)             # (B, nH, nW, C, kh, kw)
    return x.reshape(b * nh * nw, c * k * k), nh, nw


def patchify_nhwc(x, k):
    b, h, w, c = x.shape
    nh, nw = h // k, w // k
    x = x.reshape(b, nh, k, nw, k, c)
    x = x.transpose(0, 1, 3, 2, 4, 5)             # (B, nH, nW, kh, kw, C)
    return x.reshape(b * nh * nw, k * k * c), nh, nw


# ----------------------------------------------------------------------------
# Parameter preparation (padding to (8,128) tiles, bf16 MXU operands)
# ----------------------------------------------------------------------------
def _bn_fold(g, b, m, v, n_pad):
    s = g * lax.rsqrt(v + EPS)
    sh = b - m * s
    return (_pad_to(s.reshape(1, -1), (1, n_pad)),
            _pad_to(sh.reshape(1, -1), (1, n_pad)))


def _prep_conv1_w(w, n_pad):                      # patch cols ordered (Cin, kh, kw)
    cout = w.shape[0]
    wt = w.reshape(cout, -1).T
    return _pad_to(wt, (wt.shape[0], n_pad)).astype(jnp.bfloat16)


def _prep_conv_nhwc_w(w, cin_pad, n_pad):         # patch cols ordered (kh, kw, Cin_pad)
    cout, cin, kh, kw = w.shape
    w = jnp.pad(w, ((0, 0), (0, cin_pad - cin), (0, 0), (0, 0)))
    wt = w.transpose(2, 3, 1, 0).reshape(kh * kw * cin_pad, cout)
    return _pad_to(wt, (wt.shape[0], n_pad)).astype(jnp.bfloat16)


def _prep_layer(lp, d, dp, fp):
    wq, wk, wv = (lp["wqkv"][:, i * d:(i + 1) * d] for i in range(3))
    bq, bk, bv = (lp["bqkv"][:, i * d:(i + 1) * d] for i in range(3))
    wqkv = jnp.concatenate([_pad_to(wq, (dp, dp)), _pad_to(wk, (dp, dp)),
                            _pad_to(wv, (dp, dp))], axis=1).astype(jnp.bfloat16)
    bqkv = jnp.concatenate([_pad_to(bq, (1, dp)), _pad_to(bk, (1, dp)),
                            _pad_to(bv, (1, dp))], axis=1)
    return dict(
        ln1_g=_pad_to(lp["ln1_g"], (1, dp)), ln1_b=_pad_to(lp["ln1_b"], (1, dp)),
        wqkv=wqkv, bqkv=bqkv,
        wo=_pad_to(lp["wo"], (dp, dp)).astype(jnp.bfloat16),
        bo=_pad_to(lp["bo"], (1, dp)),
        ln2_g=_pad_to(lp["ln2_g"], (1, dp)), ln2_b=_pad_to(lp["ln2_b"], (1, dp)),
        w1=_pad_to(lp["w1"], (dp, fp)).astype(jnp.bfloat16),
        b1=_pad_to(lp["b1"], (1, fp)),
        w2=_pad_to(lp["w2"], (fp, dp)).astype(jnp.bfloat16),
        b2=_pad_to(lp["b2"], (1, dp)),
    )


def _prep_layer_stacks(layers, d, dp, fp):
    prepped = [_prep_layer(lp, d, dp, fp) for lp in layers]
    return {k: jnp.stack([p[k] for p in prepped], axis=0) for k in prepped[0]}


# ----------------------------------------------------------------------------
# Parameters (deterministic synthetic init — no checkpoint loading)
# ----------------------------------------------------------------------------
def init_params(key, embed_dim=64, n_layers=2, n_classes=16):
    csp = max(32, embed_dim // 4)                 # conv_stem_proj_dim
    keys = iter(jax.random.split(key, 64))

    def nrm(shape, std=0.02):
        return std * jax.random.normal(next(keys), shape, jnp.float32)

    p = {
        "conv1_w": nrm((csp, 3, 4, 4), 0.1),
        "bn1_g": jnp.ones((csp,), jnp.float32), "bn1_b": jnp.zeros((csp,), jnp.float32),
        "bn1_m": jnp.zeros((csp,), jnp.float32), "bn1_v": jnp.ones((csp,), jnp.float32),
        "conv2_w": nrm((csp, csp, 2, 2), 0.1),
        "bn2_g": jnp.ones((csp,), jnp.float32), "bn2_b": jnp.zeros((csp,), jnp.float32),
        "bn2_m": jnp.zeros((csp,), jnp.float32), "bn2_v": jnp.ones((csp,), jnp.float32),
        "conv3_w": nrm((embed_dim, csp, 2, 2), 0.1),
        "conv3_b": nrm((embed_dim,), 0.02),
        "cls_token": 0.02 * jax.random.truncated_normal(next(keys), -2.0, 2.0,
                                                        (1, 1, embed_dim), jnp.float32),
        "pos_embed": nrm((1, 1, (224 // 16) ** 2, embed_dim), 0.02),
        "post_g": jnp.ones((1, embed_dim), jnp.float32),
        "post_b": jnp.zeros((1, embed_dim), jnp.float32),
        "cls_w": nrm((embed_dim, n_classes)),
        "cls_b": jnp.zeros((1, n_classes), jnp.float32),
    }
    layers = []
    for _ in range(n_layers):
        layers.append({
            "ln1_g": jnp.ones((1, embed_dim), jnp.float32),
            "ln1_b": jnp.zeros((1, embed_dim), jnp.float32),
            "wqkv": nrm((embed_dim, 3 * embed_dim)),
            "bqkv": jnp.zeros((1, 3 * embed_dim), jnp.float32),
            "wo": nrm((embed_dim, embed_dim)),
            "bo": jnp.zeros((1, embed_dim), jnp.float32),
            "ln2_g": jnp.ones((1, embed_dim), jnp.float32),
            "ln2_b": jnp.zeros((1, embed_dim), jnp.float32),
            "w1": nrm((embed_dim, 4 * embed_dim)),
            "b1": jnp.zeros((1, 4 * embed_dim), jnp.float32),
            "w2": nrm((4 * embed_dim, embed_dim)),
            "b2": jnp.zeros((1, embed_dim), jnp.float32),
        })
    p["layers"] = layers
    return p


# ----------------------------------------------------------------------------
# Forward pass (== VisionTransformer.forward with return_image_embeddings=False)
# ----------------------------------------------------------------------------
def vit_forward(params, x, num_heads=4):
    b = x.shape[0]
    csp = params["conv1_w"].shape[0]
    d = params["conv3_w"].shape[0]
    n_classes = params["cls_w"].shape[1]
    csp_p = _round_up(csp, 128)
    dp = _round_up(d, 128)
    fp = _round_up(4 * d, 128)
    cp = _round_up(n_classes, 128)
    n_layers = len(params["layers"])

    # TODO(synk): BatchNorm is evaluated in inference mode (running statistics);
    # training-mode batch statistics are not implemented.
    # --- stem stage 1: ConvNormAct(3->csp, k4 s4 p1, BN, GELU) ---
    patches, nh, nw = patchify_nchw(x, k=4, s=4, p=1)
    patches = patches.astype(jnp.bfloat16)
    w1 = _prep_conv1_w(params["conv1_w"], csp_p)
    s1, sh1 = _bn_fold(params["bn1_g"], params["bn1_b"],
                       params["bn1_m"], params["bn1_v"], csp_p)
    y = conv_bn_act(patches, w1, s1, sh1).reshape(b, nh, nw, csp_p)

    # --- stem stage 2: ConvNormAct(csp->csp, k2 s2, BN, GELU), NHWC bf16 ---
    patches, nh, nw = patchify_nhwc(y, k=2)
    w2 = _prep_conv_nhwc_w(params["conv2_w"], csp_p, csp_p)
    s2, sh2 = _bn_fold(params["bn2_g"], params["bn2_b"],
                       params["bn2_m"], params["bn2_v"], csp_p)
    y = conv_bn_act(patches, w2, s2, sh2).reshape(b, nh, nw, csp_p)

    # --- stem stage 3 patches (the conv3 matmul itself is fused below) ---
    patches, nh, nw = patchify_nhwc(y, k=2)
    n_patches = nh * nw
    patches3 = patches.reshape(b, n_patches, -1)             # bf16
    w3 = _prep_conv_nhwc_w(params["conv3_w"], csp_p, dp)
    b3 = _pad_to(params["conv3_b"].reshape(1, -1), (1, dp))

    # --- positional embedding + cls token (zero-padded to lane width) ---
    # TODO(synk): PositionalEmbedding class not provided; assumed a learnable table
    # interpolated bilinearly over the flattened token axis (not the 2-D patch grid).
    pos = params["pos_embed"]
    if n_patches != pos.shape[2]:
        pos = jax.image.resize(pos, (1, 1, n_patches, d),
                               method="bilinear", antialias=False)
    pos = _pad_to(pos.reshape(n_patches, d), (n_patches, dp))
    cls = _pad_to(params["cls_token"].reshape(1, d), (1, dp))

    stacks = _prep_layer_stacks(params["layers"], d, dp, fp)
    post_g = _pad_to(params["post_g"], (1, dp))
    post_b = _pad_to(params["post_b"], (1, dp))
    wc = _pad_to(params["cls_w"], (dp, cp)).astype(jnp.bfloat16)
    bc = _pad_to(params["cls_b"], (1, cp))

    # emb_dropout / attn_dropout / ffn_dropout / stochastic depth are identity (p=0).
    bt = _pick_bt(b)
    out = fused_transformer(patches3, w3, b3, pos, cls, stacks, post_g, post_b,
                            wc, bc, num_heads=num_heads, d_true=d,
                            n_patches=n_patches, n_layers=n_layers, bt=bt)
    # out: (nbt, 8, cp); rows 0..bt-1 of each batch tile hold the cls logits
    return out[:, :bt, :n_classes].reshape(b, n_classes)


if __name__ == "__main__":
    key = jax.random.PRNGKey(0)
    pkey, xkey = jax.random.split(key)

    EMBED_DIM, N_LAYERS, N_HEADS, N_CLASSES = 64, 2, 4, 16
    params = init_params(pkey, embed_dim=EMBED_DIM, n_layers=N_LAYERS,
                         n_classes=N_CLASSES)

    # NCHW input, small spatial size (32x32 -> 8 -> 4 -> 2x2 patches, S = 5 with cls).
    x = jax.random.normal(xkey, (2, 3, 32, 32), jnp.float32)

    fwd = jax.jit(functools.partial(vit_forward, num_heads=N_HEADS))
    logits = fwd(params, x)
    jax.block_until_ready(logits)
    assert logits.shape == (2, N_CLASSES), logits.shape
    print("KERNEL_OK")
</pallas_src>

<mosaic_0001>
module attributes {stable_mosaic.version = 11 : i64} {
  func.func @_conv_kernel(%arg0: i32, %arg1: memref<128x48xbf16, #tpu.memory_space<vmem>>, %arg2: memref<48x128xbf16, #tpu.memory_space<vmem>>, %arg3: memref<1x128xf32, #tpu.memory_space<vmem>>, %arg4: memref<1x128xf32, #tpu.memory_space<vmem>>, %arg5: memref<128x128xbf16, #tpu.memory_space<vmem>>) attributes {dimension_semantics = [#tpu.dimension_semantics<parallel>], iteration_bounds = array<i64: 1>, scalar_prefetch = 0 : i64, scratch_operands = 0 : i64, tpu.core_type = #tpu.core_type<tc>, window_params = [{transform_indices = @transform_0, window_bounds = array<i64: 128, 48>}, {pipeline_mode = #tpu.pipeline_mode<synchronous>, transform_indices = @transform_1, window_bounds = array<i64: 48, 128>}, {pipeline_mode = #tpu.pipeline_mode<synchronous>, transform_indices = @transform_2, window_bounds = array<i64: 1, 128>}, {pipeline_mode = #tpu.pipeline_mode<synchronous>, transform_indices = @transform_3, window_bounds = array<i64: 1, 128>}, {transform_indices = @transform_4, window_bounds = array<i64: 128, 128>}]} {
    %c0 = arith.constant 0 : index
    %c0_0 = arith.constant 0 : index
    %0 = vector.load %arg1[%c0, %c0_0] : memref<128x48xbf16, #tpu.memory_space<vmem>>, vector<128x48xbf16>
    %c0_1 = arith.constant 0 : index
    %c0_2 = arith.constant 0 : index
    %1 = vector.load %arg2[%c0_1, %c0_2] : memref<48x128xbf16, #tpu.memory_space<vmem>>, vector<48x128xbf16>
    %cst = arith.constant dense<0.000000e+00> : vector<128x128xf32>
    %2 = tpu.matmul %0, %1, %cst {dimension_numbers = #tpu.dot_dimension_numbers<[1], [0], [0], [1], [0, 0, 1, 1], [], []>} : vector<128x48xbf16>, vector<48x128xbf16>, vector<128x128xf32> -> vector<128x128xf32>
    %c0_3 = arith.constant 0 : index
    %c0_4 = arith.constant 0 : index
    %3 = vector.load %arg3[%c0_3, %c0_4] : memref<1x128xf32, #tpu.memory_space<vmem>>, vector<1x128xf32>
    %4 = vector.broadcast %3 : vector<1x128xf32> to vector<128x128xf32>
    %5 = arith.mulf %2, %4 : vector<128x128xf32>
    %c0_5 = arith.constant 0 : index
    %c0_6 = arith.constant 0 : index
    %6 = vector.load %arg4[%c0_5, %c0_6] : memref<1x128xf32, #tpu.memory_space<vmem>>, vector<1x128xf32>
    %7 = vector.broadcast %6 : vector<1x128xf32> to vector<128x128xf32>
    %8 = arith.addf %5, %7 : vector<128x128xf32>
    %cst_7 = arith.constant 5.000000e-01 : f32
    %9 = vector.broadcast %cst_7 : f32 to vector<128x128xf32>
    %10 = arith.mulf %9, %8 : vector<128x128xf32>
    %cst_8 = arith.constant 0.707106769 : f32
    %11 = vector.broadcast %cst_8 : f32 to vector<128x128xf32>
    %12 = arith.mulf %8, %11 : vector<128x128xf32>
    %13 = math.erf %12 : vector<128x128xf32>
    %cst_9 = arith.constant 1.000000e+00 : f32
    %14 = vector.broadcast %cst_9 : f32 to vector<128x128xf32>
    %15 = arith.addf %14, %13 : vector<128x128xf32>
    %16 = arith.mulf %10, %15 : vector<128x128xf32>
    %17 = arith.truncf %16 : vector<128x128xf32> to vector<128x128xbf16>
    %c0_10 = arith.constant 0 : index
    %c0_11 = arith.constant 0 : index
    %18 = vector.load %arg5[%c0_10, %c0_11] : memref<128x128xbf16, #tpu.memory_space<vmem>>, vector<128x128xbf16>
    tpu.vector_store %arg5[%c0_10, %c0_11], %17 {strides = array<i32>} : memref<128x128xbf16, #tpu.memory_space<vmem>>, vector<128x128xbf16>,
    return
  }
  func.func @transform_0(%arg0: i32) -> (i32, i32) {
    %c0_i32 = arith.constant 0 : i32
    %c0_i32_0 = arith.constant 0 : i32
    return %arg0, %c0_i32 : i32, i32
  }
  func.func @transform_1(%arg0: i32) -> (i32, i32) {
    %c0_i32 = arith.constant 0 : i32
    %c0_i32_0 = arith.constant 0 : i32
    %c0_i32_1 = arith.constant 0 : i32
    return %c0_i32, %c0_i32_0 : i32, i32
  }
  func.func @transform_2(%arg0: i32) -> (i32, i32) {
    %c0_i32 = arith.constant 0 : i32
    %c0_i32_0 = arith.constant 0 : i32
    %c0_i32_1 = arith.constant 0 : i32
    return %c0_i32, %c0_i32_0 : i32, i32
  }
  func.func @transform_3(%arg0: i32) -> (i32, i32) {
    %c0_i32 = arith.constant 0 : i32
    %c0_i32_0 = arith.constant 0 : i32
    %c0_i32_1 = arith.constant 0 : i32
    return %c0_i32, %c0_i32_0 : i32, i32
  }
  func.func @transform_4(%arg0: i32) -> (i32, i32) {
    %c0_i32 = arith.constant 0 : i32
    %c0_i32_0 = arith.constant 0 : i32
    return %arg0, %c0_i32 : i32, i32
  }
}

module attributes {stable_mosaic.version = 11 : i64} {
  func.func @_conv_kernel(%arg0: i32, %arg1: memref<32x512xbf16, #tpu.memory_space<vmem>>, %arg2: memref<512x128xbf16, #tpu.memory_space<vmem>>, %arg3: memref<1x128xf32, #tpu.memory_space<vmem>>, %arg4: memref<1x128xf32, #tpu.memory_space<vmem>>, %arg5: memref<32x128xbf16, #tpu.memory_space<vmem>>) attributes {dimension_semantics = [#tpu.dimension_semantics<parallel>], iteration_bounds = array<i64: 1>, scalar_prefetch = 0 : i64, scratch_operands = 0 : i64, tpu.core_type = #tpu.core_type<tc>, window_params = [{transform_indices = @transform_0, window_bounds = array<i64: 32, 512>}, {pipeline_mode = #tpu.pipeline_mode<synchronous>, transform_indices = @transform_1, window_bounds = array<i64: 512, 128>}, {pipeline_mode = #tpu.pipeline_mode<synchronous>, transform_indices = @transform_2, window_bounds = array<i64: 1, 128>}, {pipeline_mode = #tpu.pipeline_mode<synchronous>, transform_indices = @transform_3, window_bounds = array<i64: 1, 128>}, {transform_indices = @transform_4, window_bounds = array<i64: 32, 128>}]} {
    %c0 = arith.constant 0 : index
    %c0_0 = arith.constant 0 : index
    %0 = vector.load %arg1[%c0, %c0_0] : memref<32x512xbf16, #tpu.memory_space<vmem>>, vector<32x512xbf16>
    %c0_1 = arith.constant 0 : index
    %c0_2 = arith.constant 0 : index
    %1 = vector.load %arg2[%c0_1, %c0_2] : memref<512x128xbf16, #tpu.memory_space<vmem>>, vector<512x128xbf16>
    %cst = arith.constant dense<0.000000e+00> : vector<32x128xf32>
    %2 = tpu.matmul %0, %1, %cst {dimension_numbers = #tpu.dot_dimension_numbers<[1], [0], [0], [1], [0, 0, 1, 1], [], []>} : vector<32x512xbf16>, vector<512x128xbf16>, vector<32x128xf32> -> vector<32x128xf32>
    %c0_3 = arith.constant 0 : index
    %c0_4 = arith.constant 0 : index
    %3 = vector.load %arg3[%c0_3, %c0_4] : memref<1x128xf32, #tpu.memory_space<vmem>>, vector<1x128xf32>
    %4 = vector.broadcast %3 : vector<1x128xf32> to vector<32x128xf32>
    %5 = arith.mulf %2, %4 : vector<32x128xf32>
    %c0_5 = arith.constant 0 : index
    %c0_6 = arith.constant 0 : index
    %6 = vector.load %arg4[%c0_5, %c0_6] : memref<1x128xf32, #tpu.memory_space<vmem>>, vector<1x128xf32>
    %7 = vector.broadcast %6 : vector<1x128xf32> to vector<32x128xf32>
    %8 = arith.addf %5, %7 : vector<32x128xf32>
    %cst_7 = arith.constant 5.000000e-01 : f32
    %9 = vector.broadcast %cst_7 : f32 to vector<32x128xf32>
    %10 = arith.mulf %9, %8 : vector<32x128xf32>
    %cst_8 = arith.constant 0.707106769 : f32
    %11 = vector.broadcast %cst_8 : f32 to vector<32x128xf32>
    %12 = arith.mulf %8, %11 : vector<32x128xf32>
    %13 = math.erf %12 : vector<32x128xf32>
    %cst_9 = arith.constant 1.000000e+00 : f32
    %14 = vector.broadcast %cst_9 : f32 to vector<32x128xf32>
    %15 = arith.addf %14, %13 : vector<32x128xf32>
    %16 = arith.mulf %10, %15 : vector<32x128xf32>
    %17 = arith.truncf %16 : vector<32x128xf32> to vector<32x128xbf16>
    %c0_10 = arith.constant 0 : index
    %c0_11 = arith.constant 0 : index
    %18 = vector.load %arg5[%c0_10, %c0_11] : memref<32x128xbf16, #tpu.memory_space<vmem>>, vector<32x128xbf16>
    tpu.vector_store %arg5[%c0_10, %c0_11], %17 {strides = array<i32>} : memref<32x128xbf16, #tpu.memory_space<vmem>>, vector<32x128xbf16>,
    return
  }
  func.func @transform_0(%arg0: i32) -> (i32, i32) {
    %c0_i32 = arith.constant 0 : i32
    %c0_i32_0 = arith.constant 0 : i32
    return %arg0, %c0_i32 : i32, i32
  }
  func.func @transform_1(%arg0: i32) -> (i32, i32) {
    %c0_i32 = arith.constant 0 : i32
    %c0_i32_0 = arith.constant 0 : i32
    %c0_i32_1 = arith.constant 0 : i32
    return %c0_i32, %c0_i32_0 : i32, i32
  }
  func.func @transform_2(%arg0: i32) -> (i32, i32) {
    %c0_i32 = arith.constant 0 : i32
    %c0_i32_0 = arith.constant 0 : i32
    %c0_i32_1 = arith.constant 0 : i32
    return %c0_i32, %c0_i32_0 : i32, i32
  }
  func.func @transform_3(%arg0: i32) -> (i32, i32) {
    %c0_i32 = arith.constant 0 : i32
    %c0_i32_0 = arith.constant 0 : i32
    %c0_i32_1 = arith.constant 0 : i32
    return %c0_i32, %c0_i32_0 : i32, i32
  }
  func.func @transform_4(%arg0: i32) -> (i32, i32) {
    %c0_i32 = arith.constant 0 : i32
    %c0_i32_0 = arith.constant 0 : i32
    return %arg0, %c0_i32 : i32, i32
  }
}

module attributes {stable_mosaic.version = 11 : i64} {
  func.func @_fused_vit_kernel(%arg0: i32, %arg1: i32, %arg2: memref<1x4x512xbf16, #tpu.memory_space<vmem>>, %arg3: memref<512x128xbf16, #tpu.memory_space<vmem>>, %arg4: memref<1x128xf32, #tpu.memory_space<vmem>>, %arg5: memref<4x128xf32, #tpu.memory_space<vmem>>, %arg6: memref<1x128xf32, #tpu.memory_space<vmem>>, %arg7: memref<1x1x128xf32, #tpu.memory_space<vmem>>, %arg8: memref<1x1x128xf32, #tpu.memory_space<vmem>>, %arg9: memref<1x128x384xbf16, #tpu.memory_space<vmem>>, %arg10: memref<1x1x384xf32, #tpu.memory_space<vmem>>, %arg11: memref<1x128x128xbf16, #tpu.memory_space<vmem>>, %arg12: memref<1x1x128xf32, #tpu.memory_space<vmem>>, %arg13: memref<1x1x128xf32, #tpu.memory_space<vmem>>, %arg14: memref<1x1x128xf32, #tpu.memory_space<vmem>>, %arg15: memref<1x128x256xbf16, #tpu.memory_space<vmem>>, %arg16: memref<1x1x256xf32, #tpu.memory_space<vmem>>, %arg17: memref<1x256x128xbf16, #tpu.memory_space<vmem>>, %arg18: memref<1x1x128xf32, #tpu.memory_space<vmem>>, %arg19: memref<1x128xf32, #tpu.memory_space<vmem>>, %arg20: memref<1x128xf32, #tpu.memory_space<vmem>>, %arg21: memref<128x128xbf16, #tpu.memory_space<vmem>>, %arg22: memref<1x128xf32, #tpu.memory_space<vmem>>, %arg23: memref<1x8x128xf32, #tpu.memory_space<vmem>>, %arg24: memref<1x8x128xf32, #tpu.memory_space<vmem>>) attributes {dimension_semantics = [#tpu.dimension_semantics<parallel>, #tpu.dimension_semantics<arbitrary>], iteration_bounds = array<i64: 2, 2>, scalar_prefetch = 0 : i64, scratch_operands = 1 : i64, tpu.core_type = #tpu.core_type<tc>, window_params = [{transform_indices = @transform_0, window_bounds = array<i64: 1, 4, 512>}, {pipeline_mode = #tpu.pipeline_mode<synchronous>, transform_indices = @transform_1, window_bounds = array<i64: 512, 128>}, {pipeline_mode = #tpu.pipeline_mode<synchronous>, transform_indices = @transform_2, window_bounds = array<i64: 1, 128>}, {pipeline_mode = #tpu.pipeline_mode<synchronous>, transform_indices = @transform_3, window_bounds = array<i64: 4, 128>}, {pipeline_mode = #tpu.pipeline_mode<synchronous>, transform_indices = @transform_4, window_bounds = array<i64: 1, 128>}, {transform_indices = @transform_5, window_bounds = array<i64: 1, 1, 128>}, {transform_indices = @transform_6, window_bounds = array<i64: 1, 1, 128>}, {transform_indices = @transform_7, window_bounds = array<i64: 1, 128, 384>}, {transform_indices = @transform_8, window_bounds = array<i64: 1, 1, 384>}, {transform_indices = @transform_9, window_bounds = array<i64: 1, 128, 128>}, {transform_indices = @transform_10, window_bounds = array<i64: 1, 1, 128>}, {transform_indices = @transform_11, window_bounds = array<i64: 1, 1, 128>}, {transform_indices = @transform_12, window_bounds = array<i64: 1, 1, 128>}, {transform_indices = @transform_13, window_bounds = array<i64: 1, 128, 256>}, {transform_indices = @transform_14, window_bounds = array<i64: 1, 1, 256>}, {transform_indices = @transform_15, window_bounds = array<i64: 1, 256, 128>}, {transform_indices = @transform_16, window_bounds = array<i64: 1, 1, 128>}, {pipeline_mode = #tpu.pipeline_mode<synchronous>, transform_indices = @transform_17, window_bounds = array<i64: 1, 128>}, {pipeline_mode = #tpu.pipeline_mode<synchronous>, transform_indices = @transform_18, window_bounds = array<i64: 1, 128>}, {pipeline_mode = #tpu.pipeline_mode<synchronous>, transform_indices = @transform_19, window_bounds = array<i64: 128, 128>}, {pipeline_mode = #tpu.pipeline_mode<synchronous>, transform_indices = @transform_20, window_bounds = array<i64: 1, 128>}, {transform_indices = @transform_21, window_bounds = array<i64: 1, 8, 128>}]} {
    %0 = tpu.iota {dimensions = array<i32: 1>} : vector<1x128xi32>
    %c64_i32 = arith.constant 64 : i32
    %1 = vector.broadcast %c64_i32 : i32 to vector<1x128xi32>
    %2 = arith.cmpi slt, %0, %1 : vector<1x128xi32>
    %3 = arith.extui %2 : vector<1x128xi1> to vector<1x128xi32>
    %4 = arith.sitofp %3 : vector<1x128xi32> to vector<1x128xf32>
    %c0_i32 = arith.constant 0 : i32
    %5 = vector.broadcast %c0_i32 : i32 to vector<1x128xi32>
    %6 = arith.cmpi sge, %0, %5 : vector<1x128xi32>
    %c16_i32 = arith.constant 16 : i32
    %7 = vector.broadcast %c16_i32 : i32 to vector<1x128xi32>
    %8 = arith.cmpi slt, %0, %7 : vector<1x128xi32>
    %9 = arith.andi %6, %8 : vector<1x128xi1>
    %10 = arith.extui %9 : vector<1x128xi1> to vector<1x128xi32>
    %11 = arith.sitofp %10 : vector<1x128xi32> to vector<1x128xf32>
    %c16_i32_0 = arith.constant 16 : i32
    %12 = vector.broadcast %c16_i32_0 : i32 to vector<1x128xi32>
    %13 = arith.cmpi sge, %0, %12 : vector<1x128xi32>
    %c32_i32 = arith.constant 32 : i32
    %14 = vector.broadcast %c32_i32 : i32 to vector<1x128xi32>
    %15 = arith.cmpi slt, %0, %14 : vector<1x128xi32>
    %16 = arith.andi %13, %15 : vector<1x128xi1>
    %17 = arith.extui %16 : vector<1x128xi1> to vector<1x128xi32>
    %18 = arith.sitofp %17 : vector<1x128xi32> to vector<1x128xf32>
    %c32_i32_1 = arith.constant 32 : i32
    %19 = vector.broadcast %c32_i32_1 : i32 to vector<1x128xi32>
    %20 = arith.cmpi sge, %0, %19 : vector<1x128xi32>
    %c48_i32 = arith.constant 48 : i32
    %21 = vector.broadcast %c48_i32 : i32 to vector<1x128xi32>
    %22 = arith.cmpi slt, %0, %21 : vector<1x128xi32>
    %23 = arith.andi %20, %22 : vector<1x128xi1>
    %24 = arith.extui %23 : vector<1x128xi1> to vector<1x128xi32>
    %25 = arith.sitofp %24 : vector<1x128xi32> to vector<1x128xf32>
    %c48_i32_2 = arith.constant 48 : i32
    %26 = vector.broadcast %c48_i32_2 : i32 to vector<1x128xi32>
    %27 = arith.cmpi sge, %0, %26 : vector<1x128xi32>
    %c64_i32_3 = arith.constant 64 : i32
    %28 = vector.broadcast %c64_i32_3 : i32 to vector<1x128xi32>
    %29 = arith.cmpi slt, %0, %28 : vector<1x128xi32>
    %30 = arith.andi %27, %29 : vector<1x128xi1>
    %31 = arith.extui %30 : vector<1x128xi1> to vector<1x128xi32>
    %32 = arith.sitofp %31 : vector<1x128xi32> to vector<1x128xf32>
    %33 = tpu.iota {dimensions = array<i32: 2>} : vector<1x1x8xi32>
    %c5_i32 = arith.constant 5 : i32
    %34 = vector.broadcast %c5_i32 : i32 to vector<1x1x8xi32>
    %35 = arith.cmpi slt, %33, %34 : vector<1x1x8xi32>
    %cst = arith.constant 0.000000e+00 : f32
    %cst_4 = arith.constant -1.000000e+30 : f32
    %36 = vector.broadcast %cst : f32 to vector<1x1x8xf32>
    %37 = vector.broadcast %cst_4 : f32 to vector<1x1x8xf32>
    %38 = arith.select %35, %36, %37 : vector<1x1x8xi1>, vector<1x1x8xf32>
    %39 = tpu.iota {dimensions = array<i32: 1>} : vector<1x8x1xi32>
    %c5_i32_5 = arith.constant 5 : i32
    %40 = vector.broadcast %c5_i32_5 : i32 to vector<1x8x1xi32>
    %41 = arith.cmpi slt, %39, %40 : vector<1x8x1xi32>
    %42 = arith.extui %41 : vector<1x8x1xi1> to vector<1x8x1xi32>
    %43 = arith.sitofp %42 : vector<1x8x1xi32> to vector<1x8x1xf32>
    %c0_i32_6 = arith.constant 0 : i32
    %44 = arith.cmpi eq, %arg1, %c0_i32_6 : i32
    %45 = arith.extui %44 : i1 to i32
    %c0_i32_7 = arith.constant 0 : i32
    %46 = arith.cmpi ne, %45, %c0_i32_7 : i32
    scf.if %46 {
      %c0_85 = arith.constant 0 : index
      %c0_86 = arith.constant 0 : index
      %c0_87 = arith.constant 0 : index
      %260 = vector.load %arg2[%c0_85, %c0_86, %c0_87] : memref<1x4x512xbf16, #tpu.memory_space<vmem>>, vector<1x4x512xbf16>
      %261 = vector.shape_cast %260 : vector<1x4x512xbf16> to vector<4x512xbf16>
      %c0_88 = arith.constant 0 : index
      %c0_89 = arith.constant 0 : index
      %262 = vector.load %arg3[%c0_88, %c0_89] : memref<512x128xbf16, #tpu.memory_space<vmem>>, vector<512x128xbf16>
      %cst_90 = arith.constant dense<0.000000e+00> : vector<4x128xf32>
      %263 = tpu.matmul %261, %262, %cst_90 {dimension_numbers = #tpu.dot_dimension_numbers<[1], [0], [0], [1], [0, 0, 1, 1], [], []>} : vector<4x512xbf16>, vector<512x128xbf16>, vector<4x128xf32> -> vector<4x128xf32>
      %c0_91 = arith.constant 0 : index
      %c0_92 = arith.constant 0 : index
      %264 = vector.load %arg4[%c0_91, %c0_92] : memref<1x128xf32, #tpu.memory_space<vmem>>, vector<1x128xf32>
      %265 = vector.broadcast %264 : vector<1x128xf32> to vector<4x128xf32>
      %266 = arith.addf %263, %265 : vector<4x128xf32>
      %267 = vector.shape_cast %266 : vector<4x128xf32> to vector<1x4x128xf32>
      %c0_93 = arith.constant 0 : index
      %c0_94 = arith.constant 0 : index
      %268 = vector.load %arg5[%c0_93, %c0_94] : memref<4x128xf32, #tpu.memory_space<vmem>>, vector<4x128xf32>
      %269 = vector.shape_cast %268 : vector<4x128xf32> to vector<1x4x128xf32>
      %270 = arith.addf %267, %269 : vector<1x4x128xf32>
      %c0_95 = arith.constant 0 : index
      %c0_96 = arith.constant 0 : index
      %271 = vector.load %arg6[%c0_95, %c0_96] : memref<1x128xf32, #tpu.memory_space<vmem>>, vector<1x128xf32>
      %272 = vector.shape_cast %271 : vector<1x128xf32> to vector<1x1x128xf32>
      %cst_97 = arith.constant 0.000000e+00 : f32
      %273 = vector.broadcast %cst_97 : f32 to vector<1x3x128xf32>
      %274 = tpu.concatenate %272, %270, %273 in 1 : vector<1x1x128xf32>, vector<1x4x128xf32>, vector<1x3x128xf32> -> vector<1x8x128xf32>
      %c0_98 = arith.constant 0 : index
      %c0_99 = arith.constant 0 : index
      %c0_100 = arith.constant 0 : index
      %275 = vector.load %arg24[%c0_98, %c0_99, %c0_100] : memref<1x8x128xf32, #tpu.memory_space<vmem>>, vector<1x8x128xf32>
      tpu.vector_store %arg24[%c0_98, %c0_99, %c0_100], %274 {strides = array<i32>} : memref<1x8x128xf32, #tpu.memory_space<vmem>>, vector<1x8x128xf32>,
    } else {
    }
    %c0 = arith.constant 0 : index
    %c0_8 = arith.constant 0 : index
    %c0_9 = arith.constant 0 : index
    %47 = vector.load %arg24[%c0, %c0_8, %c0_9] : memref<1x8x128xf32, #tpu.memory_space<vmem>>, vector<1x8x128xf32>
    %48 = vector.shape_cast %47 : vector<1x8x128xf32> to vector<8x128xf32>
    %c0_10 = arith.constant 0 : index
    %c0_11 = arith.constant 0 : index
    %c0_12 = arith.constant 0 : index
    %49 = vector.load %arg7[%c0_10, %c0_11, %c0_12] : memref<1x1x128xf32, #tpu.memory_space<vmem>>, vector<1x1x128xf32>
    %50 = vector.shape_cast %49 : vector<1x1x128xf32> to vector<1x128xf32>
    %c0_13 = arith.constant 0 : index
    %c0_14 = arith.constant 0 : index
    %c0_15 = arith.constant 0 : index
    %51 = vector.load %arg8[%c0_13, %c0_14, %c0_15] : memref<1x1x128xf32, #tpu.memory_space<vmem>>, vector<1x1x128xf32>
    %52 = vector.shape_cast %51 : vector<1x1x128xf32> to vector<1x128xf32>
    %cst_16 = arith.constant dense<0.000000e+00> : vector<8xf32>
    %53 = vector.multi_reduction <add>, %48, %cst_16 [1] : vector<8x128xf32> to vector<8xf32>
    %54 = vector.shape_cast %53 : vector<8xf32> to vector<8x1xf32>
    %cst_17 = arith.constant 1.562500e-02 : f32
    %55 = vector.broadcast %cst_17 : f32 to vector<8x1xf32>
    %56 = arith.mulf %54, %55 : vector<8x1xf32>
    %57 = vector.broadcast %56 : vector<8x1xf32> to vector<8x128xf32>
    %58 = arith.subf %48, %57 : vector<8x128xf32>
    %59 = vector.broadcast %4 : vector<1x128xf32> to vector<8x128xf32>
    %60 = arith.mulf %58, %59 : vector<8x128xf32>
    %61 = arith.mulf %60, %60 : vector<8x128xf32>
    %cst_18 = arith.constant dense<0.000000e+00> : vector<8xf32>
    %62 = vector.multi_reduction <add>, %61, %cst_18 [1] : vector<8x128xf32> to vector<8xf32>
    %63 = vector.shape_cast %62 : vector<8xf32> to vector<8x1xf32>
    %cst_19 = arith.constant 1.562500e-02 : f32
    %64 = vector.broadcast %cst_19 : f32 to vector<8x1xf32>
    %65 = arith.mulf %63, %64 : vector<8x1xf32>
    %cst_20 = arith.constant 9.99999974E-6 : f32
    %66 = vector.broadcast %cst_20 : f32 to vector<8x1xf32>
    %67 = arith.addf %65, %66 : vector<8x1xf32>
    %68 = math.rsqrt %67 : vector<8x1xf32>
    %69 = vector.broadcast %68 : vector<8x1xf32> to vector<8x128xf32>
    %70 = arith.mulf %60, %69 : vector<8x128xf32>
    %71 = vector.broadcast %50 : vector<1x128xf32> to vector<8x128xf32>
    %72 = arith.mulf %70, %71 : vector<8x128xf32>
    %73 = vector.broadcast %52 : vector<1x128xf32> to vector<8x128xf32>
    %74 = arith.addf %72, %73 : vector<8x128xf32>
    %75 = arith.truncf %74 : vector<8x128xf32> to vector<8x128xbf16>
    %c0_21 = arith.constant 0 : index
    %c0_22 = arith.constant 0 : index
    %c0_23 = arith.constant 0 : index
    %76 = vector.load %arg9[%c0_21, %c0_22, %c0_23] : memref<1x128x384xbf16, #tpu.memory_space<vmem>>, vector<1x128x384xbf16>
    %77 = vector.shape_cast %76 : vector<1x128x384xbf16> to vector<128x384xbf16>
    %cst_24 = arith.constant dense<0.000000e+00> : vector<8x384xf32>
    %78 = tpu.matmul %75, %77, %cst_24 {dimension_numbers = #tpu.dot_dimension_numbers<[1], [0], [0], [1], [0, 0, 1, 1], [], []>} : vector<8x128xbf16>, vector<128x384xbf16>, vector<8x384xf32> -> vector<8x384xf32>
    %c0_25 = arith.constant 0 : index
    %c0_26 = arith.constant 0 : index
    %c0_27 = arith.constant 0 : index
    %79 = vector.load %arg10[%c0_25, %c0_26, %c0_27] : memref<1x1x384xf32, #tpu.memory_space<vmem>>, vector<1x1x384xf32>
    %80 = vector.shape_cast %79 : vector<1x1x384xf32> to vector<1x384xf32>
    %81 = vector.broadcast %80 : vector<1x384xf32> to vector<8x384xf32>
    %82 = arith.addf %78, %81 : vector<8x384xf32>
    %83 = vector.extract_strided_slice %82 {offsets = [0, 0], sizes = [8, 128], strides = [1, 1]} : vector<8x384xf32> to vector<8x128xf32>
    %cst_28 = arith.constant 2.500000e-01 : f32
    %84 = vector.broadcast %cst_28 : f32 to vector<8x128xf32>
    %85 = arith.mulf %83, %84 : vector<8x128xf32>
    %86 = vector.shape_cast %85 : vector<8x128xf32> to vector<1x8x128xf32>
    %87 = vector.extract_strided_slice %82 {offsets = [0, 128], sizes = [8, 128], strides = [1, 1]} : vector<8x384xf32> to vector<8x128xf32>
    %88 = vector.shape_cast %87 : vector<8x128xf32> to vector<1x8x128xf32>
    %89 = vector.extract_strided_slice %82 {offsets = [0, 256], sizes = [8, 128], strides = [1, 1]} : vector<8x384xf32> to vector<8x128xf32>
    %90 = vector.shape_cast %89 : vector<8x128xf32> to vector<1x8x128xf32>
    %cst_29 = arith.constant 0.000000e+00 : f32
    %91 = vector.broadcast %cst_29 : f32 to vector<1x8x128xf32>
    %92 = arith.truncf %86 : vector<1x8x128xf32> to vector<1x8x128xbf16>
    %93 = vector.shape_cast %11 : vector<1x128xf32> to vector<1x1x128xf32>
    %94 = vector.broadcast %93 : vector<1x1x128xf32> to vector<1x8x128xf32>
    %95 = arith.mulf %88, %94 : vector<1x8x128xf32>
    %96 = arith.truncf %95 : vector<1x8x128xf32> to vector<1x8x128xbf16>
    "tpu.trace_start"() <{level = 10 : i32, message = "bqd,bkd->bqk"}> : () -> ()
    %cst_30 = arith.constant dense<0.000000e+00> : vector<1x8x8xf32>
    %97 = tpu.matmul %92, %96, %cst_30 {dimension_numbers = #tpu.dot_dimension_numbers<[2], [2], [1], [1], [0, 0, 0, 1, 1, 1], [0], [0]>} : vector<1x8x128xbf16>, vector<1x8x128xbf16>, vector<1x8x8xf32> -> vector<1x8x8xf32>
    "tpu.trace_stop"() : () -> ()
    %98 = vector.broadcast %38 : vector<1x1x8xf32> to vector<1x8x8xf32>
    %99 = arith.addf %97, %98 : vector<1x8x8xf32>
    %cst_31 = arith.constant dense<0xFF800000> : vector<1x8xf32>
    %100 = vector.multi_reduction <maximumf>, %99, %cst_31 [2] : vector<1x8x8xf32> to vector<1x8xf32>
    %101 = vector.shape_cast %100 : vector<1x8xf32> to vector<1x8x1xf32>
    %102 = vector.broadcast %101 : vector<1x8x1xf32> to vector<1x8x8xf32>
    %103 = arith.subf %99, %102 : vector<1x8x8xf32>
    %104 = math.exp %103 : vector<1x8x8xf32>
    %cst_32 = arith.constant dense<0.000000e+00> : vector<1x8xf32>
    %105 = vector.multi_reduction <add>, %104, %cst_32 [2] : vector<1x8x8xf32> to vector<1x8xf32>
    %106 = vector.shape_cast %105 : vector<1x8xf32> to vector<1x8x1xf32>
    %107 = tpu.reciprocal %106 {approx = true} : vector<1x8x1xf32> -> vector<1x8x1xf32>
    %108 = vector.broadcast %107 : vector<1x8x1xf32> to vector<1x8x8xf32>
    %109 = arith.mulf %104, %108 : vector<1x8x8xf32>
    %110 = arith.truncf %109 : vector<1x8x8xf32> to vector<1x8x8xbf16>
    %111 = vector.shape_cast %11 : vector<1x128xf32> to vector<1x1x128xf32>
    %112 = vector.broadcast %111 : vector<1x1x128xf32> to vector<1x8x128xf32>
    %113 = arith.mulf %90, %112 : vector<1x8x128xf32>
    %114 = arith.truncf %113 : vector<1x8x128xf32> to vector<1x8x128xbf16>
    "tpu.trace_start"() <{level = 10 : i32, message = "bqk,bkd->bqd"}> : () -> ()
    %cst_33 = arith.constant dense<0.000000e+00> : vector<1x8x128xf32>
    %115 = tpu.matmul %110, %114, %cst_33 {dimension_numbers = #tpu.dot_dimension_numbers<[2], [1], [1], [2], [0, 0, 0, 1, 1, 2], [0], [0]>} : vector<1x8x8xbf16>, vector<1x8x128xbf16>, vector<1x8x128xf32> -> vector<1x8x128xf32>
    "tpu.trace_stop"() : () -> ()
    %116 = arith.addf %91, %115 : vector<1x8x128xf32>
    %117 = arith.truncf %86 : vector<1x8x128xf32> to vector<1x8x128xbf16>
    %118 = vector.shape_cast %18 : vector<1x128xf32> to vector<1x1x128xf32>
    %119 = vector.broadcast %118 : vector<1x1x128xf32> to vector<1x8x128xf32>
    %120 = arith.mulf %88, %119 : vector<1x8x128xf32>
    %121 = arith.truncf %120 : vector<1x8x128xf32> to vector<1x8x128xbf16>
    "tpu.trace_start"() <{level = 10 : i32, message = "bqd,bkd->bqk"}> : () -> ()
    %cst_34 = arith.constant dense<0.000000e+00> : vector<1x8x8xf32>
    %122 = tpu.matmul %117, %121, %cst_34 {dimension_numbers = #tpu.dot_dimension_numbers<[2], [2], [1], [1], [0, 0, 0, 1, 1, 1], [0], [0]>} : vector<1x8x128xbf16>, vector<1x8x128xbf16>, vector<1x8x8xf32> -> vector<1x8x8xf32>
    "tpu.trace_stop"() : () -> ()
    %123 = vector.broadcast %38 : vector<1x1x8xf32> to vector<1x8x8xf32>
    %124 = arith.addf %122, %123 : vector<1x8x8xf32>
    %cst_35 = arith.constant dense<0xFF800000> : vector<1x8xf32>
    %125 = vector.multi_reduction <maximumf>, %124, %cst_35 [2] : vector<1x8x8xf32> to vector<1x8xf32>
    %126 = vector.shape_cast %125 : vector<1x8xf32> to vector<1x8x1xf32>
    %127 = vector.broadcast %126 : vector<1x8x1xf32> to vector<1x8x8xf32>
    %128 = arith.subf %124, %127 : vector<1x8x8xf32>
    %129 = math.exp %128 : vector<1x8x8xf32>
    %cst_36 = arith.constant dense<0.000000e+00> : vector<1x8xf32>
    %130 = vector.multi_reduction <add>, %129, %cst_36 [2] : vector<1x8x8xf32> to vector<1x8xf32>
    %131 = vector.shape_cast %130 : vector<1x8xf32> to vector<1x8x1xf32>
    %132 = tpu.reciprocal %131 {approx = true} : vector<1x8x1xf32> -> vector<1x8x1xf32>
    %133 = vector.broadcast %132 : vector<1x8x1xf32> to vector<1x8x8xf32>
    %134 = arith.mulf %129, %133 : vector<1x8x8xf32>
    %135 = arith.truncf %134 : vector<1x8x8xf32> to vector<1x8x8xbf16>
    %136 = vector.shape_cast %18 : vector<1x128xf32> to vector<1x1x128xf32>
    %137 = vector.broadcast %136 : vector<1x1x128xf32> to vector<1x8x128xf32>
    %138 = arith.mulf %90, %137 : vector<1x8x128xf32>
    %139 = arith.truncf %138 : vector<1x8x128xf32> to vector<1x8x128xbf16>
    "tpu.trace_start"() <{level = 10 : i32, message = "bqk,bkd->bqd"}> : () -> ()
    %cst_37 = arith.constant dense<0.000000e+00> : vector<1x8x128xf32>
    %140 = tpu.matmul %135, %139, %cst_37 {dimension_numbers = #tpu.dot_dimension_numbers<[2], [1], [1], [2], [0, 0, 0, 1, 1, 2], [0], [0]>} : vector<1x8x8xbf16>, vector<1x8x128xbf16>, vector<1x8x128xf32> -> vector<1x8x128xf32>
    "tpu.trace_stop"() : () -> ()
    %141 = arith.addf %116, %140 : vector<1x8x128xf32>
    %142 = arith.truncf %86 : vector<1x8x128xf32> to vector<1x8x128xbf16>
    %143 = vector.shape_cast %25 : vector<1x128xf32> to vector<1x1x128xf32>
    %144 = vector.broadcast %143 : vector<1x1x128xf32> to vector<1x8x128xf32>
    %145 = arith.mulf %88, %144 : vector<1x8x128xf32>
    %146 = arith.truncf %145 : vector<1x8x128xf32> to vector<1x8x128xbf16>
    "tpu.trace_start"() <{level = 10 : i32, message = "bqd,bkd->bqk"}> : () -> ()
    %cst_38 = arith.constant dense<0.000000e+00> : vector<1x8x8xf32>
    %147 = tpu.matmul %142, %146, %cst_38 {dimension_numbers = #tpu.dot_dimension_numbers<[2], [2], [1], [1], [0, 0, 0, 1, 1, 1], [0], [0]>} : vector<1x8x128xbf16>, vector<1x8x128xbf16>, vector<1x8x8xf32> -> vector<1x8x8xf32>
    "tpu.trace_stop"() : () -> ()
    %148 = vector.broadcast %38 : vector<1x1x8xf32> to vector<1x8x8xf32>
    %149 = arith.addf %147, %148 : vector<1x8x8xf32>
    %cst_39 = arith.constant dense<0xFF800000> : vector<1x8xf32>
    %150 = vector.multi_reduction <maximumf>, %149, %cst_39 [2] : vector<1x8x8xf32> to vector<1x8xf32>
    %151 = vector.shape_cast %150 : vector<1x8xf32> to vector<1x8x1xf32>
    %152 = vector.broadcast %151 : vector<1x8x1xf32> to vector<1x8x8xf32>
    %153 = arith.subf %149, %152 : vector<1x8x8xf32>
    %154 = math.exp %153 : vector<1x8x8xf32>
    %cst_40 = arith.constant dense<0.000000e+00> : vector<1x8xf32>
    %155 = vector.multi_reduction <add>, %154, %cst_40 [2] : vector<1x8x8xf32> to vector<1x8xf32>
    %156 = vector.shape_cast %155 : vector<1x8xf32> to vector<1x8x1xf32>
    %157 = tpu.reciprocal %156 {approx = true} : vector<1x8x1xf32> -> vector<1x8x1xf32>
    %158 = vector.broadcast %157 : vector<1x8x1xf32> to vector<1x8x8xf32>
    %159 = arith.mulf %154, %158 : vector<1x8x8xf32>
    %160 = arith.truncf %159 : vector<1x8x8xf32> to vector<1x8x8xbf16>
    %161 = vector.shape_cast %25 : vector<1x128xf32> to vector<1x1x128xf32>
    %162 = vector.broadcast %161 : vector<1x1x128xf32> to vector<1x8x128xf32>
    %163 = arith.mulf %90, %162 : vector<1x8x128xf32>
    %164 = arith.truncf %163 : vector<1x8x128xf32> to vector<1x8x128xbf16>
    "tpu.trace_start"() <{level = 10 : i32, message = "bqk,bkd->bqd"}> : () -> ()
    %cst_41 = arith.constant dense<0.000000e+00> : vector<1x8x128xf32>
    %165 = tpu.matmul %160, %164, %cst_41 {dimension_numbers = #tpu.dot_dimension_numbers<[2], [1], [1], [2], [0, 0, 0, 1, 1, 2], [0], [0]>} : vector<1x8x8xbf16>, vector<1x8x128xbf16>, vector<1x8x128xf32> -> vector<1x8x128xf32>
    "tpu.trace_stop"() : () -> ()
    %166 = arith.addf %141, %165 : vector<1x8x128xf32>
    %167 = arith.truncf %86 : vector<1x8x128xf32> to vector<1x8x128xbf16>
    %168 = vector.shape_cast %32 : vector<1x128xf32> to vector<1x1x128xf32>
    %169 = vector.broadcast %168 : vector<1x1x128xf32> to vector<1x8x128xf32>
    %170 = arith.mulf %88, %169 : vector<1x8x128xf32>
    %171 = arith.truncf %170 : vector<1x8x128xf32> to vector<1x8x128xbf16>
    "tpu.trace_start"() <{level = 10 : i32, message = "bqd,bkd->bqk"}> : () -> ()
    %cst_42 = arith.constant dense<0.000000e+00> : vector<1x8x8xf32>
    %172 = tpu.matmul %167, %171, %cst_42 {dimension_numbers = #tpu.dot_dimension_numbers<[2], [2], [1], [1], [0, 0, 0, 1, 1, 1], [0], [0]>} : vector<1x8x128xbf16>, vector<1x8x128xbf16>, vector<1x8x8xf32> -> vector<1x8x8xf32>
    "tpu.trace_stop"() : () -> ()
    %173 = vector.broadcast %38 : vector<1x1x8xf32> to vector<1x8x8xf32>
    %174 = arith.addf %172, %173 : vector<1x8x8xf32>
    %cst_43 = arith.constant dense<0xFF800000> : vector<1x8xf32>
    %175 = vector.multi_reduction <maximumf>, %174, %cst_43 [2] : vector<1x8x8xf32> to vector<1x8xf32>
    %176 = vector.shape_cast %175 : vector<1x8xf32> to vector<1x8x1xf32>
    %177 = vector.broadcast %176 : vector<1x8x1xf32> to vector<1x8x8xf32>
    %178 = arith.subf %174, %177 : vector<1x8x8xf32>
    %179 = math.exp %178 : vector<1x8x8xf32>
    %cst_44 = arith.constant dense<0.000000e+00> : vector<1x8xf32>
    %180 = vector.multi_reduction <add>, %179, %cst_44 [2] : vector<1x8x8xf32> to vector<1x8xf32>
    %181 = vector.shape_cast %180 : vector<1x8xf32> to vector<1x8x1xf32>
    %182 = tpu.reciprocal %181 {approx = true} : vector<1x8x1xf32> -> vector<1x8x1xf32>
    %183 = vector.broadcast %182 : vector<1x8x1xf32> to vector<1x8x8xf32>
    %184 = arith.mulf %179, %183 : vector<1x8x8xf32>
    %185 = arith.truncf %184 : vector<1x8x8xf32> to vector<1x8x8xbf16>
    %186 = vector.shape_cast %32 : vector<1x128xf32> to vector<1x1x128xf32>
    %187 = vector.broadcast %186 : vector<1x1x128xf32> to vector<1x8x128xf32>
    %188 = arith.mulf %90, %187 : vector<1x8x128xf32>
    %189 = arith.truncf %188 : vector<1x8x128xf32> to vector<1x8x128xbf16>
    "tpu.trace_start"() <{level = 10 : i32, message = "bqk,bkd->bqd"}> : () -> ()
    %cst_45 = arith.constant dense<0.000000e+00> : vector<1x8x128xf32>
    %190 = tpu.matmul %185, %189, %cst_45 {dimension_numbers = #tpu.dot_dimension_numbers<[2], [1], [1], [2], [0, 0, 0, 1, 1, 2], [0], [0]>} : vector<1x8x8xbf16>, vector<1x8x128xbf16>, vector<1x8x128xf32> -> vector<1x8x128xf32>
    "tpu.trace_stop"() : () -> ()
    %191 = arith.addf %166, %190 : vector<1x8x128xf32>
    %192 = vector.shape_cast %191 : vector<1x8x128xf32> to vector<8x128xf32>
    %193 = arith.truncf %192 : vector<8x128xf32> to vector<8x128xbf16>
    %c0_46 = arith.constant 0 : index
    %c0_47 = arith.constant 0 : index
    %c0_48 = arith.constant 0 : index
    %194 = vector.load %arg11[%c0_46, %c0_47, %c0_48] : memref<1x128x128xbf16, #tpu.memory_space<vmem>>, vector<1x128x128xbf16>
    %195 = vector.shape_cast %194 : vector<1x128x128xbf16> to vector<128x128xbf16>
    %cst_49 = arith.constant dense<0.000000e+00> : vector<8x128xf32>
    %196 = tpu.matmul %193, %195, %cst_49 {dimension_numbers = #tpu.dot_dimension_numbers<[1], [0], [0], [1], [0, 0, 1, 1], [], []>} : vector<8x128xbf16>, vector<128x128xbf16>, vector<8x128xf32> -> vector<8x128xf32>
    %c0_50 = arith.constant 0 : index
    %c0_51 = arith.constant 0 : index
    %c0_52 = arith.constant 0 : index
    %197 = vector.load %arg12[%c0_50, %c0_51, %c0_52] : memref<1x1x128xf32, #tpu.memory_space<vmem>>, vector<1x1x128xf32>
    %198 = vector.shape_cast %197 : vector<1x1x128xf32> to vector<1x128xf32>
    %199 = vector.broadcast %198 : vector<1x128xf32> to vector<8x128xf32>
    %200 = arith.addf %196, %199 : vector<8x128xf32>
    %201 = arith.addf %48, %200 : vector<8x128xf32>
    %c0_53 = arith.constant 0 : index
    %c0_54 = arith.constant 0 : index
    %c0_55 = arith.constant 0 : index
    %202 = vector.load %arg13[%c0_53, %c0_54, %c0_55] : memref<1x1x128xf32, #tpu.memory_space<vmem>>, vector<1x1x128xf32>
    %203 = vector.shape_cast %202 : vector<1x1x128xf32> to vector<1x128xf32>
    %c0_56 = arith.constant 0 : index
    %c0_57 = arith.constant 0 : index
    %c0_58 = arith.constant 0 : index
    %204 = vector.load %arg14[%c0_56, %c0_57, %c0_58] : memref<1x1x128xf32, #tpu.memory_space<vmem>>, vector<1x1x128xf32>
    %205 = vector.shape_cast %204 : vector<1x1x128xf32> to vector<1x128xf32>
    %cst_59 = arith.constant dense<0.000000e+00> : vector<8xf32>
    %206 = vector.multi_reduction <add>, %201, %cst_59 [1] : vector<8x128xf32> to vector<8xf32>
    %207 = vector.shape_cast %206 : vector<8xf32> to vector<8x1xf32>
    %cst_60 = arith.constant 1.562500e-02 : f32
    %208 = vector.broadcast %cst_60 : f32 to vector<8x1xf32>
    %209 = arith.mulf %207, %208 : vector<8x1xf32>
    %210 = vector.broadcast %209 : vector<8x1xf32> to vector<8x128xf32>
    %211 = arith.subf %201, %210 : vector<8x128xf32>
    %212 = vector.broadcast %4 : vector<1x128xf32> to vector<8x128xf32>
    %213 = arith.mulf %211, %212 : vector<8x128xf32>
    %214 = arith.mulf %213, %213 : vector<8x128xf32>
    %cst_61 = arith.constant dense<0.000000e+00> : vector<8xf32>
    %215 = vector.multi_reduction <add>, %214, %cst_61 [1] : vector<8x128xf32> to vector<8xf32>
    %216 = vector.shape_cast %215 : vector<8xf32> to vector<8x1xf32>
    %cst_62 = arith.constant 1.562500e-02 : f32
    %217 = vector.broadcast %cst_62 : f32 to vector<8x1xf32>
    %218 = arith.mulf %216, %217 : vector<8x1xf32>
    %cst_63 = arith.constant 9.99999974E-6 : f32
    %219 = vector.broadcast %cst_63 : f32 to vector<8x1xf32>
    %220 = arith.addf %218, %219 : vector<8x1xf32>
    %221 = math.rsqrt %220 : vector<8x1xf32>
    %222 = vector.broadcast %221 : vector<8x1xf32> to vector<8x128xf32>
    %223 = arith.mulf %213, %222 : vector<8x128xf32>
    %224 = vector.broadcast %203 : vector<1x128xf32> to vector<8x128xf32>
    %225 = arith.mulf %223, %224 : vector<8x128xf32>
    %226 = vector.broadcast %205 : vector<1x128xf32> to vector<8x128xf32>
    %227 = arith.addf %225, %226 : vector<8x128xf32>
    %228 = arith.truncf %227 : vector<8x128xf32> to vector<8x128xbf16>
    %c0_64 = arith.constant 0 : index
    %c0_65 = arith.constant 0 : index
    %c0_66 = arith.constant 0 : index
    %229 = vector.load %arg15[%c0_64, %c0_65, %c0_66] : memref<1x128x256xbf16, #tpu.memory_space<vmem>>, vector<1x128x256xbf16>
    %230 = vector.shape_cast %229 : vector<1x128x256xbf16> to vector<128x256xbf16>
    %cst_67 = arith.constant dense<0.000000e+00> : vector<8x256xf32>
    %231 = tpu.matmul %228, %230, %cst_67 {dimension_numbers = #tpu.dot_dimension_numbers<[1], [0], [0], [1], [0, 0, 1, 1], [], []>} : vector<8x128xbf16>, vector<128x256xbf16>, vector<8x256xf32> -> vector<8x256xf32>
    %c0_68 = arith.constant 0 : index
    %c0_69 = arith.constant 0 : index
    %c0_70 = arith.constant 0 : index
    %232 = vector.load %arg16[%c0_68, %c0_69, %c0_70] : memref<1x1x256xf32, #tpu.memory_space<vmem>>, vector<1x1x256xf32>
    %233 = vector.shape_cast %232 : vector<1x1x256xf32> to vector<1x256xf32>
    %234 = vector.broadcast %233 : vector<1x256xf32> to vector<8x256xf32>
    %235 = arith.addf %231, %234 : vector<8x256xf32>
    %cst_71 = arith.constant 5.000000e-01 : f32
    %236 = vector.broadcast %cst_71 : f32 to vector<8x256xf32>
    %237 = arith.mulf %236, %235 : vector<8x256xf32>
    %cst_72 = arith.constant 0.707106769 : f32
    %238 = vector.broadcast %cst_72 : f32 to vector<8x256xf32>
    %239 = arith.mulf %235, %238 : vector<8x256xf32>
    %240 = math.erf %239 : vector<8x256xf32>
    %cst_73 = arith.constant 1.000000e+00 : f32
    %241 = vector.broadcast %cst_73 : f32 to vector<8x256xf32>
    %242 = arith.addf %241, %240 : vector<8x256xf32>
    %243 = arith.mulf %237, %242 : vector<8x256xf32>
    %244 = arith.truncf %243 : vector<8x256xf32> to vector<8x256xbf16>
    %c0_74 = arith.constant 0 : index
    %c0_75 = arith.constant 0 : index
    %c0_76 = arith.constant 0 : index
    %245 = vector.load %arg17[%c0_74, %c0_75, %c0_76] : memref<1x256x128xbf16, #tpu.memory_space<vmem>>, vector<1x256x128xbf16>
    %246 = vector.shape_cast %245 : vector<1x256x128xbf16> to vector<256x128xbf16>
    %cst_77 = arith.constant dense<0.000000e+00> : vector<8x128xf32>
    %247 = tpu.matmul %244, %246, %cst_77 {dimension_numbers = #tpu.dot_dimension_numbers<[1], [0], [0], [1], [0, 0, 1, 1], [], []>} : vector<8x256xbf16>, vector<256x128xbf16>, vector<8x128xf32> -> vector<8x128xf32>
    %c0_78 = arith.constant 0 : index
    %c0_79 = arith.constant 0 : index
    %c0_80 = arith.constant 0 : index
    %248 = vector.load %arg18[%c0_78, %c0_79, %c0_80] : memref<1x1x128xf32, #tpu.memory_space<vmem>>, vector<1x1x128xf32>
    %249 = vector.shape_cast %248 : vector<1x1x128xf32> to vector<1x128xf32>
    %250 = vector.broadcast %249 : vector<1x128xf32> to vector<8x128xf32>
    %251 = arith.addf %247, %250 : vector<8x128xf32>
    %252 = arith.addf %201, %251 : vector<8x128xf32>
    %253 = vector.shape_cast %252 : vector<8x128xf32> to vector<1x8x128xf32>
    %254 = vector.broadcast %43 : vector<1x8x1xf32> to vector<1x8x128xf32>
    %255 = arith.mulf %253, %254 : vector<1x8x128xf32>
    %c0_81 = arith.constant 0 : index
    %c0_82 = arith.constant 0 : index
    %c0_83 = arith.constant 0 : index
    %256 = vector.load %arg24[%c0_81, %c0_82, %c0_83] : memref<1x8x128xf32, #tpu.memory_space<vmem>>, vector<1x8x128xf32>
    tpu.vector_store %arg24[%c0_81, %c0_82, %c0_83], %255 {strides = array<i32>} : memref<1x8x128xf32, #tpu.memory_space<vmem>>, vector<1x8x128xf32>,
    %c1_i32 = arith.constant 1 : i32
    %257 = arith.cmpi eq, %arg1, %c1_i32 : i32
    %258 = arith.extui %257 : i1 to i32
    %c0_i32_84 = arith.constant 0 : i32
    %259 = arith.cmpi ne, %258, %c0_i32_84 : i32
    scf.if %259 {
      %260 = vector.extract_strided_slice %255 {offsets = [0, 0, 0], sizes = [1, 1, 128], strides = [1, 1, 1]} : vector<1x8x128xf32> to vector<1x1x128xf32>
      %261 = vector.shape_cast %260 : vector<1x1x128xf32> to vector<1x128xf32>
      %cst_85 = arith.constant 0.000000e+00 : f32
      %262 = vector.broadcast %cst_85 : f32 to vector<7x128xf32>
      %263 = tpu.concatenate %261, %262 in 0 : vector<1x128xf32>, vector<7x128xf32> -> vector<8x128xf32>
      %c0_86 = arith.constant 0 : index
      %c0_87 = arith.constant 0 : index
      %264 = vector.load %arg19[%c0_86, %c0_87] : memref<1x128xf32, #tpu.memory_space<vmem>>, vector<1x128xf32>
      %c0_88 = arith.constant 0 : index
      %c0_89 = arith.constant 0 : index
      %265 = vector.load %arg20[%c0_88, %c0_89] : memref<1x128xf32, #tpu.memory_space<vmem>>, vector<1x128xf32>
      %cst_90 = arith.constant dense<0.000000e+00> : vector<8xf32>
      %266 = vector.multi_reduction <add>, %263, %cst_90 [1] : vector<8x128xf32> to vector<8xf32>
      %267 = vector.shape_cast %266 : vector<8xf32> to vector<8x1xf32>
      %cst_91 = arith.constant 1.562500e-02 : f32
      %268 = vector.broadcast %cst_91 : f32 to vector<8x1xf32>
      %269 = arith.mulf %267, %268 : vector<8x1xf32>
      %270 = vector.broadcast %269 : vector<8x1xf32> to vector<8x128xf32>
      %271 = arith.subf %263, %270 : vector<8x128xf32>
      %272 = vector.broadcast %4 : vector<1x128xf32> to vector<8x128xf32>
      %273 = arith.mulf %271, %272 : vector<8x128xf32>
      %274 = arith.mulf %273, %273 : vector<8x128xf32>
      %cst_92 = arith.constant dense<0.000000e+00> : vector<8xf32>
      %275 = vector.multi_reduction <add>, %274, %cst_92 [1] : vector<8x128xf32> to vector<8xf32>
      %276 = vector.shape_cast %275 : vector<8xf32> to vector<8x1xf32>
      %cst_93 = arith.constant 1.562500e-02 : f32
      %277 = vector.broadcast %cst_93 : f32 to vector<8x1xf32>
      %278 = arith.mulf %276, %277 : vector<8x1xf32>
      %cst_94 = arith.constant 9.99999974E-6 : f32
      %279 = vector.broadcast %cst_94 : f32 to vector<8x1xf32>
      %280 = arith.addf %278, %279 : vector<8x1xf32>
      %281 = math.rsqrt %280 : vector<8x1xf32>
      %282 = vector.broadcast %281 : vector<8x1xf32> to vector<8x128xf32>
      %283 = arith.mulf %273, %282 : vector<8x128xf32>
      %284 = vector.broadcast %264 : vector<1x128xf32> to vector<8x128xf32>
      %285 = arith.mulf %283, %284 : vector<8x128xf32>
      %286 = vector.broadcast %265 : vector<1x128xf32> to vector<8x128xf32>
      %287 = arith.addf %285, %286 : vector<8x128xf32>
      %288 = arith.truncf %287 : vector<8x128xf32> to vector<8x128xbf16>
      %c0_95 = arith.constant 0 : index
      %c0_96 = arith.constant 0 : index
      %289 = vector.load %arg21[%c0_95, %c0_96] : memref<128x128xbf16, #tpu.memory_space<vmem>>, vector<128x128xbf16>
      %cst_97 = arith.constant dense<0.000000e+00> : vector<8x128xf32>
      %290 = tpu.matmul %288, %289, %cst_97 {dimension_numbers = #tpu.dot_dimension_numbers<[1], [0], [0], [1], [0, 0, 1, 1], [], []>} : vector<8x128xbf16>, vector<128x128xbf16>, vector<8x128xf32> -> vector<8x128xf32>
      %c0_98 = arith.constant 0 : index
      %c0_99 = arith.constant 0 : index
      %291 = vector.load %arg22[%c0_98, %c0_99] : memref<1x128xf32, #tpu.memory_space<vmem>>, vector<1x128xf32>
      %292 = vector.broadcast %291 : vector<1x128xf32> to vector<8x128xf32>
      %293 = arith.addf %290, %292 : vector<8x128xf32>
      %294 = vector.shape_cast %293 : vector<8x128xf32> to vector<1x8x128xf32>
      %c0_100 = arith.constant 0 : index
      %c0_101 = arith.constant 0 : index
      %c0_102 = arith.constant 0 : index
      %295 = vector.load %arg23[%c0_100, %c0_101, %c0_102] : memref<1x8x128xf32, #tpu.memory_space<vmem>>, vector<1x8x128xf32>
      tpu.vector_store %arg23[%c0_100, %c0_101, %c0_102], %294 {strides = array<i32>} : memref<1x8x128xf32, #tpu.memory_space<vmem>>, vector<1x8x128xf32>,
    } else {
    }
    return
  }
  func.func @transform_0(%arg0: i32, %arg1: i32) -> (i32, i32, i32) {
    %c0_i32 = arith.constant 0 : i32
    %c0_i32_0 = arith.constant 0 : i32
    %c0_i32_1 = arith.constant 0 : i32
    return %arg0, %c0_i32, %c0_i32_0 : i32, i32, i32
  }
  func.func @transform_1(%arg0: i32, %arg1: i32) -> (i32, i32) {
    %c0_i32 = arith.constant 0 : i32
    %c0_i32_0 = arith.constant 0 : i32
    %c0_i32_1 = arith.constant 0 : i32
    return %c0_i32, %c0_i32_0 : i32, i32
  }
  func.func @transform_2(%arg0: i32, %arg1: i32) -> (i32, i32) {
    %c0_i32 = arith.constant 0 : i32
    %c0_i32_0 = arith.constant 0 : i32
    %c0_i32_1 = arith.constant 0 : i32
    return %c0_i32, %c0_i32_0 : i32, i32
  }
  func.func @transform_3(%arg0: i32, %arg1: i32) -> (i32, i32) {
    %c0_i32 = arith.constant 0 : i32
    %c0_i32_0 = arith.constant 0 : i32
    %c0_i32_1 = arith.constant 0 : i32
    return %c0_i32, %c0_i32_0 : i32, i32
  }
  func.func @transform_4(%arg0: i32, %arg1: i32) -> (i32, i32) {
    %c0_i32 = arith.constant 0 : i32
    %c0_i32_0 = arith.constant 0 : i32
    %c0_i32_1 = arith.constant 0 : i32
    return %c0_i32, %c0_i32_0 : i32, i32
  }
  func.func @transform_5(%arg0: i32, %arg1: i32) -> (i32, i32, i32) {
    %c0_i32 = arith.constant 0 : i32
    %c0_i32_0 = arith.constant 0 : i32
    %c0_i32_1 = arith.constant 0 : i32
    return %arg1, %c0_i32, %c0_i32_0 : i32, i32, i32
  }
  func.func @transform_6(%arg0: i32, %arg1: i32) -> (i32, i32, i32) {
    %c0_i32 = arith.constant 0 : i32
    %c0_i32_0 = arith.constant 0 : i32
    %c0_i32_1 = arith.constant 0 : i32
    return %arg1, %c0_i32, %c0_i32_0 : i32, i32, i32
  }
  func.func @transform_7(%arg0: i32, %arg1: i32) -> (i32, i32, i32) {
    %c0_i32 = arith.constant 0 : i32
    %c0_i32_0 = arith.constant 0 : i32
    %c0_i32_1 = arith.constant 0 : i32
    return %arg1, %c0_i32, %c0_i32_0 : i32, i32, i32
  }
  func.func @transform_8(%arg0: i32, %arg1: i32) -> (i32, i32, i32) {
    %c0_i32 = arith.constant 0 : i32
    %c0_i32_0 = arith.constant 0 : i32
    %c0_i32_1 = arith.constant 0 : i32
    return %arg1, %c0_i32, %c0_i32_0 : i32, i32, i32
  }
  func.func @transform_9(%arg0: i32, %arg1: i32) -> (i32, i32, i32) {
    %c0_i32 = arith.constant 0 : i32
    %c0_i32_0 = arith.constant 0 : i32
    %c0_i32_1 = arith.constant 0 : i32
    return %arg1, %c0_i32, %c0_i32_0 : i32, i32, i32
  }
  func.func @transform_10(%arg0: i32, %arg1: i32) -> (i32, i32, i32) {
    %c0_i32 = arith.constant 0 : i32
    %c0_i32_0 = arith.constant 0 : i32
    %c0_i32_1 = arith.constant 0 : i32
    return %arg1, %c0_i32, %c0_i32_0 : i32, i32, i32
  }
  func.func @transform_11(%arg0: i32, %arg1: i32) -> (i32, i32, i32) {
    %c0_i32 = arith.constant 0 : i32
    %c0_i32_0 = arith.constant 0 : i32
    %c0_i32_1 = arith.constant 0 : i32
    return %arg1, %c0_i32, %c0_i32_0 : i32, i32, i32
  }
  func.func @transform_12(%arg0: i32, %arg1: i32) -> (i32, i32, i32) {
    %c0_i32 = arith.constant 0 : i32
    %c0_i32_0 = arith.constant 0 : i32
    %c0_i32_1 = arith.constant 0 : i32
    return %arg1, %c0_i32, %c0_i32_0 : i32, i32, i32
  }
  func.func @transform_13(%arg0: i32, %arg1: i32) -> (i32, i32, i32) {
    %c0_i32 = arith.constant 0 : i32
    %c0_i32_0 = arith.constant 0 : i32
    %c0_i32_1 = arith.constant 0 : i32
    return %arg1, %c0_i32, %c0_i32_0 : i32, i32, i32
  }
  func.func @transform_14(%arg0: i32, %arg1: i32) -> (i32, i32, i32) {
    %c0_i32 = arith.constant 0 : i32
    %c0_i32_0 = arith.constant 0 : i32
    %c0_i32_1 = arith.constant 0 : i32
    return %arg1, %c0_i32, %c0_i32_0 : i32, i32, i32
  }
  func.func @transform_15(%arg0: i32, %arg1: i32) -> (i32, i32, i32) {
    %c0_i32 = arith.constant 0 : i32
    %c0_i32_0 = arith.constant 0 : i32
    %c0_i32_1 = arith.constant 0 : i32
    return %arg1, %c0_i32, %c0_i32_0 : i32, i32, i32
  }
  func.func @transform_16(%arg0: i32, %arg1: i32) -> (i32, i32, i32) {
    %c0_i32 = arith.constant 0 : i32
    %c0_i32_0 = arith.constant 0 : i32
    %c0_i32_1 = arith.constant 0 : i32
    return %arg1, %c0_i32, %c0_i32_0 : i32, i32, i32
  }
  func.func @transform_17(%arg0: i32, %arg1: i32) -> (i32, i32) {
    %c0_i32 = arith.constant 0 : i32
    %c0_i32_0 = arith.constant 0 : i32
    %c0_i32_1 = arith.constant 0 : i32
    return %c0_i32, %c0_i32_0 : i32, i32
  }
  func.func @transform_18(%arg0: i32, %arg1: i32) -> (i32, i32) {
    %c0_i32 = arith.constant 0 : i32
    %c0_i32_0 = arith.constant 0 : i32
    %c0_i32_1 = arith.constant 0 : i32
    return %c0_i32, %c0_i32_0 : i32, i32
  }
  func.func @transform_19(%arg0: i32, %arg1: i32) -> (i32, i32) {
    %c0_i32 = arith.constant 0 : i32
    %c0_i32_0 = arith.constant 0 : i32
    %c0_i32_1 = arith.constant 0 : i32
    return %c0_i32, %c0_i32_0 : i32, i32
  }
  func.func @transform_20(%arg0: i32, %arg1: i32) -> (i32, i32) {
    %c0_i32 = arith.constant 0 : i32
    %c0_i32_0 = arith.constant 0 : i32
    %c0_i32_1 = arith.constant 0 : i32
    return %c0_i32, %c0_i32_0 : i32, i32
  }
  func.func @transform_21(%arg0: i32, %arg1: i32) -> (i32, i32, i32) {
    %c0_i32 = arith.constant 0 : i32
    %c0_i32_0 = arith.constant 0 : i32
    %c0_i32_1 = arith.constant 0 : i32
    return %arg0, %c0_i32, %c0_i32_0 : i32, i32, i32
  }
}

</mosaic_0001>

<bundles_post_ra>
// kernel: vit_forward.3
= control target key start
LH: loop header
LB: loop body
LE: loop exit
PB: predicated region body
PF: predicated region fallthrough
CT: control target
= control target key end

     0   :  { %vm98_vm0 = vcmask 392192   ;;  %s808_s1 = inlined_call_operand.vmem [shape: bf16[48,128], index: 1, kind: input, shape index: {}]   ;;  %s809_s0 = inlined_call_operand.vmem [shape: bf16[128,48], index: 0, kind: input, shape index: {}]   ;;  %s810_s2 = inlined_call_operand.vmem [shape: f32[1,128], index: 2, kind: input, shape index: {}]   ;;  %s811_s3 = inlined_call_operand.vmem [shape: f32[1,128], index: 3, kind: input, shape index: {}]   ;;  %s812_s4 = inlined_call_operand.vmem [shape: bf16[128,128], index: 4, kind: output, shape index: {}]  }
   0x1   :  { %v569_v0 = vld [vmem:[%s808_s1 + $0x10] sm:$0xff]   ;;  %v570_v1 = vld [vmem:[%s808_s1 + $0x8] sm:$0xff]   ;;  %v571_v2 = vld [vmem:[%s808_s1] sm:$0xff]  }
   0x2   :  { %541 = vmatprep.subr.bf16.mxu0 %v569_v0  ;;  %563 = vmatprep.subr.bf16.mxu1 %v569_v0  ;;  %v572_v3 = vld [vmem:[%s809_s0] sm:$0xff]   ;;  %v574_v5 = vld [vmem:[%s809_s0 + $0x8] sm:$0xff]   ;;  %v576_v7 = vld [vmem:[%s809_s0 + $0x10] sm:$0xff]  }
   0x3   :  { %542 = vmatpush3.bf16.msra.mxu0 %v569_v0  ;;  %566 = vmatpush3.bf16.msra.mxu1 %v569_v0  ;;  %v573_v4 = vld [vmem:[%s809_s0 + $0x20] sm:$0xff]   ;;  %v575_v6 = vld [vmem:[%s809_s0 + $0x28] sm:$0xff]   ;;  %v577_v8 = vld [vmem:[%s809_s0 + $0x30] sm:$0xff]  }
   0x4   :  { %543 = vmatprep.subr.bf16.mxu0 %v570_v1  ;;  %564 = vmatprep.subr.bf16.mxu1 %v570_v1  ;;  %v578_v9 = vld [vmem:[%s809_s0 + $0x18] sm:$0xff]   ;;  %v681_v11 = vld [vmem:[%s810_s2] ss:$0 sm:$0xff] }
   0x5   :  { %547 = vmatprep.mubr.msk.bf16.mxu0 %vm98_vm0, %v572_v3  ;;  %555 = vmatprep.mubr.msk.bf16.mxu1 %vm98_vm0, %v573_v4  ;;  %v579_v10 = vld [vmem:[%s809_s0 + $0x38] sm:$0xff]   ;;  %v686_v13 = vld [vmem:[%s811_s3] ss:$0 sm:$0xff] }
   0x7   :  { %544 = vmatpush3.bf16.msra.mxu0 %v570_v1  ;;  %567 = vmatpush3.bf16.msra.mxu1 %v570_v1 }
   0x8   :  { %545 = vmatprep.subr.bf16.mxu0 %v571_v2  ;;  %565 = vmatprep.subr.bf16.mxu1 %v571_v2 }
   0xb   :  { %546 = vmatpush3.bf16.msra.mxu0 %v571_v2  ;;  %568 = vmatpush3.bf16.msra.mxu1 %v571_v2 }
   0xe   :  { %548 = vmatmul.mubr.msk.bf16.vlgmr.msra.gmra.mxu0 %vm98_vm0, %v574_v5  ;;  %556 = vmatmul.mubr.msk.bf16.vlgmr.msra.gmra.mxu1 %vm98_vm0, %v575_v6 }
   0xf   :  { %551 = vmatprep.mubr.msk.bf16.mxu0 %vm98_vm0, %v576_v7  ;;  %559 = vmatprep.mubr.msk.bf16.mxu1 %vm98_vm0, %v577_v8 }
  0x16   :  { %552 = vmatmul.mubr.msk.bf16.gmra.mxu0 %vm98_vm0, %v578_v9  ;;  %560 = vmatmul.mubr.msk.bf16.gmra.mxu1 %vm98_vm0, %v579_v10 }
  0xce   :  { %v549_v12 = vpop.f32.mrf.mxu0  ;;  %v557_v14 = vpop.f32.mrf.mxu1 }
  0xcf   :  { %v229_v15 = vmul.f32 %v549_v12, %v681_v11  ;;  %v237_v16 = vmul.f32 %v557_v14, %v681_v11 }
  0xd0   :  { %v157_v17 = vpop.f32.mrf.mxu0  ;;  %v189_v18 = vpop.f32.mrf.mxu1 }
  0xd1   :  { %v691_v19 = vadd.f32 %v686_v13, %v229_v15  ;;  %v694_v20 = vadd.f32 %v686_v13, %v237_v16  ;;  %v227_v21 = vmul.f32 %v681_v11, %v157_v17  ;;  %v235_v22 = vmul.f32 %v681_v11, %v189_v18 }
  0xd2   :  { %v550_v23 = vpop.f32.mrf.mxu0  ;;  %v558_v24 = vpop.f32.mrf.mxu1 }
  0xd3   :  { %v284_v25 = vmul.f32 0.70710677, %v691_v19  ;;  %v292_v26 = vmul.f32 0.70710677, %v694_v20  ;;  %v701_v27 = vadd.f32 %v686_v13, %v227_v21  ;;  %v704_v28 = vadd.f32 %v686_v13, %v235_v22 }
  0xd4   :  { %v230_v29 = vmul.f32 %v550_v23, %v681_v11  ;;  %v238_v30 = vmul.f32 %v558_v24, %v681_v11  ;;  %v160_v31 = vpop.f32.mrf.mxu0  ;;  %v192_v32 = vpop.f32.mrf.mxu1  ;;  %v276_v23 = vmul.f32 0.5, %v694_v20 }
  0xd5   :  { %v228_v33 = vmul.f32 %v681_v11, %v160_v31  ;;  %v236_v34 = vmul.f32 %v681_v11, %v192_v32  ;;  %580 = verf.f32 %v284_v25  ;;  %v282_v35 = vmul.f32 0.70710677, %v701_v27 }
  0xd6   :  { %v553_v36 = vpop.f32.mrf.mxu0  ;;  %v561_v37 = vpop.f32.mrf.mxu1  ;;  %v290_v38 = vmul.f32 0.70710677, %v704_v28  ;;  %v713_v39 = vadd.f32 %v686_v13, %v230_v29  ;;  %v716_v40 = vadd.f32 %v686_v13, %v238_v30  ;;  %582 = verf.f32 %v292_v26 }
  0xd7   :  { %v719_v41 = vadd.f32 %v686_v13, %v228_v33  ;;  %v722_v42 = vadd.f32 %v686_v13, %v236_v34  ;;  %v233_v43 = vmul.f32 %v553_v36, %v681_v11  ;;  %v241_v44 = vmul.f32 %v561_v37, %v681_v11 }
  0xd8   :  { %v173_v45 = vpop.f32.mrf.mxu0  ;;  %v205_v46 = vpop.f32.mrf.mxu1  ;;  %584 = verf.f32 %v282_v35  ;;  %v285_v47 = vmul.f32 0.70710677, %v713_v39  ;;  %v293_v48 = vmul.f32 0.70710677, %v716_v40  ;;  %v266_v25 = vmul.f32 0.5, %v701_v27 }
  0xd9   :  { %586 = verf.f32 %v290_v38  ;;  %v283_v49 = vmul.f32 0.70710677, %v719_v41  ;;  %v291_v51 = vmul.f32 0.70710677, %v722_v42  ;;  %v731_v52 = vadd.f32 %v686_v13, %v233_v43 }
  0xda   :  { %v554_v50 = vpop.f32.mrf.mxu0  ;;  %588 = verf.f32 %v285_v47  ;;  %v734_v53 = vadd.f32 %v686_v13, %v241_v44  ;;  %v562_v54 = vpop.f32.mrf.mxu1  ;;  %v231_v55 = vmul.f32 %v681_v11, %v173_v45  ;;  %v239_v56 = vmul.f32 %v681_v11, %v205_v46 }
  0xdb   :  { %590 = verf.f32 %v293_v48  ;;  %v234_v57 = vmul.f32 %v554_v50, %v681_v11  ;;  %v288_v59 = vmul.f32 0.70710677, %v731_v52  ;;  %v242_v0 = vmul.f32 %v562_v54, %v681_v11 }
  0xdc   :  { %v176_v58 = vpop.f32.mrf.mxu0  ;;  %592 = verf.f32 %v283_v49  ;;  %v296_v60 = vmul.f32 0.70710677, %v734_v53  ;;  %v742_v61 = vadd.f32 %v686_v13, %v231_v55  ;;  %v745_v62 = vadd.f32 %v686_v13, %v239_v56  ;;  %v208_v2 = vpop.f32.mrf.mxu1 }
  0xdd   :  { %594 = verf.f32 %v291_v51  ;;  %v748_v63 = vadd.f32 %v686_v13, %v234_v57  ;;  %v232_v1 = vmul.f32 %v681_v11, %v176_v58  ;;  %v756_v6 = vadd.f32 %v686_v13, %v242_v0 }
  0xde   :  { %596 = verf.f32 %v288_v59  ;;  %v286_v3 = vmul.f32 0.70710677, %v742_v61  ;;  %v294_v4 = vmul.f32 0.70710677, %v745_v62  ;;  %v240_v8 = vmul.f32 %v681_v11, %v208_v2 }
  0xdf   :  { %598 = verf.f32 %v296_v60  ;;  %v289_v5 = vmul.f32 0.70710677, %v748_v63  ;;  %v759_v7 = vadd.f32 %v686_v13, %v232_v1  ;;  %v297_v10 = vmul.f32 0.70710677, %v756_v6 }
  0xe0   :  { %600 = verf.f32 %v286_v3  ;;  %v765_v15 = vadd.f32 %v686_v13, %v240_v8  ;;  %v268_v11 = vmul.f32 0.5, %v691_v19  ;;  %v269_v30 = vmul.f32 0.5, %v713_v39 }
  0xe1   :  { %602 = verf.f32 %v294_v4  ;;  %v287_v12 = vmul.f32 0.70710677, %v759_v7  ;;  %v274_v32 = vmul.f32 0.5, %v704_v28  ;;  %v277_v34 = vmul.f32 0.5, %v716_v40 }
  0xe2   :  { %v581_v9 = vpop.eup %580  ;;  %604 = verf.f32 %v289_v5  ;;  %v295_v21 = vmul.f32 0.70710677, %v765_v15  ;;  %v267_v20 = vmul.f32 0.5, %v719_v41  ;;  %v275_v44 = vmul.f32 0.5, %v722_v42 }
  0xe3   :  { %v583_v14 = vpop.eup %582  ;;  %606 = verf.f32 %v297_v10  ;;  %v316_v18 = vadd.f32 1.0, %v581_v9  ;;  %v272_v59 = vmul.f32 0.5, %v731_v52  ;;  %v273_v0 = vmul.f32 0.5, %v748_v63 }
  0xe4   :  { %608 = verf.f32 %v287_v12  ;;  %v324_v24 = vadd.f32 1.0, %v583_v14  ;;  %v280_v3 = vmul.f32 0.5, %v734_v53  ;;  %v270_v4 = vmul.f32 0.5, %v742_v61 }
  0xe5   :  { %v585_v16 = vpop.eup %584  ;;  %610 = verf.f32 %v295_v21  ;;  %v332_v19 = vmul.f32 %v316_v18, %v268_v11  ;;  %v281_v5 = vmul.f32 0.5, %v756_v6  ;;  %v271_v12 = vmul.f32 0.5, %v759_v7 }
  0xe6   :  { %v587_v17 = vpop.eup %586  ;;  %v314_v29 = vadd.f32 1.0, %v585_v16  ;;  %v340_v27 = vmul.f32 %v324_v24, %v276_v23  ;;  %v278_v11 = vmul.f32 0.5, %v745_v62  ;;  %v279_v61 = vmul.f32 0.5, %v765_v15 }
  0xe7   :  { %v589_v22 = vpop.eup %588  ;;  %v322_v33 = vadd.f32 1.0, %v587_v17 }
  0xe8   :  { %v591_v26 = vpop.eup %590  ;;  %v317_v13 = vadd.f32 1.0, %v589_v22  ;;  %v330_v46 = vmul.f32 %v314_v29, %v266_v25 }
  0xe9   :  { %v593_v31 = vpop.eup %592  ;;  %v325_v35 = vadd.f32 1.0, %v591_v26  ;;  %v338_v49 = vmul.f32 %v322_v33, %v274_v32 }
  0xea   :  { %v595_v36 = vpop.eup %594  ;;  %v333_v37 = vmul.f32 %v317_v13, %v269_v30  ;;  %v315_v38 = vadd.f32 1.0, %v593_v31 }
  0xeb   :  { %v341_v43 = vmul.f32 %v325_v35, %v277_v34  ;;  %v323_v39 = vadd.f32 1.0, %v595_v36  ;;  %v597_v45 = vpop.eup %596 }
  0xec   :  { %v491_v47 = vpack.c.bf16 %v333_v37, %v332_v19  ;;  %v331_v48 = vmul.f32 %v315_v38, %v267_v20  ;;  %v599_v28 = vpop.eup %598  ;;  %v320_v55 = vadd.f32 1.0, %v597_v45 }
  0xed   :  { %v511_v50 = vpack.c.bf16 %v341_v43, %v340_v27  ;;  %v339_v40 = vmul.f32 %v323_v39, %v275_v44  ;;  %v601_v51 = vpop.eup %600  ;;  %v328_v57 = vadd.f32 1.0, %v599_v28 }
  0xee   :  { %523 = vst [vmem:[%s812_s4 + $0x8] sm:$0xff] %v491_v47   ;;  %v486_v41 = vpack.c.bf16 %v331_v48, %v330_v46  ;;  %v603_v54 = vpop.eup %602  ;;  %v318_v60 = vadd.f32 1.0, %v601_v51  ;;  %v336_v9 = vmul.f32 %v320_v55, %v272_v59 }
  0xef   :  { %527 = vst [vmem:[%s812_s4 + $0x28] sm:$0xff] %v511_v50   ;;  %v506_v42 = vpack.c.bf16 %v339_v40, %v338_v49  ;;  %v605_v56 = vpop.eup %604  ;;  %v344_v16 = vmul.f32 %v328_v57, %v280_v3  ;;  %v326_v17 = vadd.f32 1.0, %v603_v54 }
  0xf0   :  { %487 = vst [vmem:[%s812_s4] sm:$0xff] %v486_v41   ;;  %v607_v58 = vpop.eup %606  ;;  %v321_v1 = vadd.f32 1.0, %v605_v56  ;;  %v334_v21 = vmul.f32 %v318_v60, %v270_v4 }
  0xf1   :  { %526 = vst [vmem:[%s812_s4 + $0x20] sm:$0xff] %v506_v42   ;;  %v609_v2 = vpop.eup %608  ;;  %v329_v8 = vadd.f32 1.0, %v607_v58  ;;  %v342_v7 = vmul.f32 %v326_v17, %v278_v11 }
  0xf2   :  { %v337_v10 = vmul.f32 %v321_v1, %v273_v0  ;;  %v319_v14 = vadd.f32 1.0, %v609_v2  ;;  %v611_v18 = vpop.eup %610 }
  0xf3   :  { %v345_v52 = vmul.f32 %v329_v8, %v281_v5  ;;  %v327_v23 = vadd.f32 1.0, %v611_v18 }
  0xf4   :  { %v501_v63 = vpack.c.bf16 %v337_v10, %v336_v9  ;;  %v335_v22 = vmul.f32 %v319_v14, %v271_v12 }
  0xf5   :  { %v521_v53 = vpack.c.bf16 %v345_v52, %v344_v16  ;;  %v343_v24 = vmul.f32 %v327_v23, %v279_v61 }
  0xf6   :  { %525 = vst [vmem:[%s812_s4 + $0x18] sm:$0xff] %v501_v63   ;;  %v496_v6 = vpack.c.bf16 %v335_v22, %v334_v21 }
  0xf7   :  { %529 = vst [vmem:[%s812_s4 + $0x38] sm:$0xff] %v521_v53   ;;  %v516_v62 = vpack.c.bf16 %v343_v24, %v342_v7 }
  0xf8   :  { %524 = vst [vmem:[%s812_s4 + $0x10] sm:$0xff] %v496_v6  }
  0xf9   :  { %528 = vst [vmem:[%s812_s4 + $0x30] sm:$0xff] %v516_v62  }

// kernel: vit_forward.4
= control target key start
LH: loop header
LB: loop body
LE: loop exit
PB: predicated region body
PF: predicated region fallthrough
CT: control target
= control target key end

     0   :  { %s812_s1 = inlined_call_operand.vmem [shape: bf16[512,128], index: 1, kind: input, shape index: {}]   ;;  %s813_s0 = inlined_call_operand.vmem [shape: bf16[32,512], index: 0, kind: input, shape index: {}]   ;;  %s814_s2 = inlined_call_operand.vmem [shape: f32[1,128], index: 2, kind: input, shape index: {}]   ;;  %s815_s3 = inlined_call_operand.vmem [shape: f32[1,128], index: 3, kind: input, shape index: {}]   ;;  %s816_s4 = inlined_call_operand.vmem [shape: bf16[32,128], index: 4, kind: output, shape index: {}]  }
   0x1   :  { %v603_v0 = vld [vmem:[%s812_s1 + $0x78] sm:$0xff]   ;;  %v607_v4 = vld [vmem:[%s812_s1 + $0x70] sm:$0xff]   ;;  %v611_v8 = vld [vmem:[%s812_s1 + $0x68] sm:$0xff]  }
   0x2   :  { %v604_v1 = vld [vmem:[%s812_s1 + $0xf8] sm:$0xff]   ;;  %547 = vmatprep.subr.bf16.mxu0 %v603_v0  ;;  %v608_v5 = vld [vmem:[%s812_s1 + $0xf0] sm:$0xff]   ;;  %v612_v9 = vld [vmem:[%s812_s1 + $0xe8] sm:$0xff]  }
   0x3   :  { %v605_v2 = vld [vmem:[%s812_s1 + $0x38] sm:$0xff]   ;;  %575 = vmatprep.subr.bf16.mxu1 %v604_v1  ;;  %v609_v6 = vld [vmem:[%s812_s1 + $0x30] sm:$0xff]   ;;  %v613_v10 = vld [vmem:[%s812_s1 + $0x28] sm:$0xff]  }
   0x4   :  { %v606_v3 = vld [vmem:[%s812_s1 + $0xb8] sm:$0xff]   ;;  %548 = vmatpush3.bf16.msra.mxu0 %v605_v2  ;;  %v610_v7 = vld [vmem:[%s812_s1 + $0xb0] sm:$0xff]   ;;  %v614_v11 = vld [vmem:[%s812_s1 + $0xa8] sm:$0xff]  }
   0x5   :  { %576 = vmatpush3.bf16.msra.mxu1 %v606_v3  ;;  %549 = vmatprep.subr.bf16.mxu0 %v607_v4  ;;  %v615_v12 = vld [vmem:[%s812_s1 + $0x60] sm:$0xff]   ;;  %v619_v16 = vld [vmem:[%s812_s1 + $0x58] sm:$0xff]   ;;  %v623_v20 = vld [vmem:[%s812_s1 + $0x50] sm:$0xff]  }
   0x6   :  { %577 = vmatprep.subr.bf16.mxu1 %v608_v5  ;;  %v616_v13 = vld [vmem:[%s812_s1 + $0xe0] sm:$0xff]   ;;  %v620_v17 = vld [vmem:[%s812_s1 + $0xd8] sm:$0xff]   ;;  %v624_v21 = vld [vmem:[%s812_s1 + $0xd0] sm:$0xff]  }
   0x7   :  { %v617_v14 = vld [vmem:[%s812_s1 + $0x20] sm:$0xff]   ;;  %v621_v18 = vld [vmem:[%s812_s1 + $0x18] sm:$0xff]   ;;  %v625_v22 = vld [vmem:[%s812_s1 + $0x10] sm:$0xff]  }
   0x8   :  { %550 = vmatpush3.bf16.msra.mxu0 %v609_v6  ;;  %v618_v15 = vld [vmem:[%s812_s1 + $0xa0] sm:$0xff]   ;;  %v622_v19 = vld [vmem:[%s812_s1 + $0x98] sm:$0xff]   ;;  %v626_v23 = vld [vmem:[%s812_s1 + $0x90] sm:$0xff]  }
   0x9   :  { %578 = vmatpush3.bf16.msra.mxu1 %v610_v7  ;;  %551 = vmatprep.subr.bf16.mxu0 %v611_v8  ;;  %v627_v24 = vld [vmem:[%s812_s1 + $0x48] sm:$0xff]   ;;  %v631_v28 = vld [vmem:[%s812_s1 + $0x40] sm:$0xff]  }
   0xa   :  { %579 = vmatprep.subr.bf16.mxu1 %v612_v9  ;;  %v628_v25 = vld [vmem:[%s812_s1 + $0xc8] sm:$0xff]   ;;  %v632_v29 = vld [vmem:[%s812_s1 + $0xc0] sm:$0xff]  }
   0xb   :  { %v629_v26 = vld [vmem:[%s812_s1 + $0x8] sm:$0xff]   ;;  %v633_v30 = vld [vmem:[%s812_s1] sm:$0xff]  }
   0xc   :  { %552 = vmatpush3.bf16.msra.mxu0 %v613_v10  ;;  %v630_v27 = vld [vmem:[%s812_s1 + $0x88] sm:$0xff]   ;;  %v634_v31 = vld [vmem:[%s812_s1 + $0x80] sm:$0xff]  }
   0xd   :  { %580 = vmatpush3.bf16.msra.mxu1 %v614_v11  ;;  %553 = vmatprep.subr.bf16.mxu0 %v615_v12  ;;  %v635_v32 = vld [vmem:[%s813_s0] ss:$16 sps:$4 sm:$0xff]   ;;  %v637_v33 = vld [vmem:[%s813_s0 + $0x4] ss:$16 sps:$4 sm:$0xff]   ;;  %v638_v34 = vld [vmem:[%s813_s0 + $0x8] ss:$16 sps:$4 sm:$0xff]  }
   0xe   :  { %581 = vmatprep.subr.bf16.mxu1 %v616_v13  ;;  %v640_v35 = vld [vmem:[%s813_s0 + $0xc] ss:$16 sps:$4 sm:$0xff]   ;;  %354 = vmatprep.mubr.bf16.mxu0 %v637_v33  ;;  %v641_v36 = vld [vmem:[%s813_s0 + $0x24] ss:$16 sps:$4 sm:$0xff]   ;;  %v645_v38 = vld [vmem:[%s813_s0 + $0x20] ss:$16 sps:$4 sm:$0xff]  }
   0xf   :  { %403 = vmatprep.mubr.bf16.mxu1 %v640_v35  ;;  %v643_v37 = vld [vmem:[%s813_s0 + $0x2c] ss:$16 sps:$4 sm:$0xff]   ;;  %v646_v39 = vld [vmem:[%s813_s0 + $0x28] ss:$16 sps:$4 sm:$0xff]   ;;  %v526_v47 = vld [vmem:[%s814_s2] ss:$0 sm:$0xff] }
  0x10   :  { %554 = vmatpush3.bf16.msra.mxu0 %v617_v14  ;;  %v527_v51 = vld [vmem:[%s815_s3] ss:$0 sm:$0xff] }
  0x11   :  { %582 = vmatpush3.bf16.msra.mxu1 %v618_v15  ;;  %555 = vmatprep.subr.bf16.mxu0 %v619_v16 }
  0x12   :  { %583 = vmatprep.subr.bf16.mxu1 %v620_v17 }
  0x14   :  { %556 = vmatpush3.bf16.msra.mxu0 %v621_v18 }
  0x15   :  { %584 = vmatpush3.bf16.msra.mxu1 %v622_v19  ;;  %557 = vmatprep.subr.bf16.mxu0 %v623_v20 }
  0x16   :  { %585 = vmatprep.subr.bf16.mxu1 %v624_v21 }
  0x18   :  { %558 = vmatpush3.bf16.msra.mxu0 %v625_v22 }
  0x19   :  { %586 = vmatpush3.bf16.msra.mxu1 %v626_v23  ;;  %559 = vmatprep.subr.bf16.mxu0 %v627_v24 }
  0x1a   :  { %587 = vmatprep.subr.bf16.mxu1 %v628_v25 }
  0x1c   :  { %560 = vmatpush3.bf16.msra.mxu0 %v629_v26 }
  0x1d   :  { %588 = vmatpush3.bf16.msra.mxu1 %v630_v27  ;;  %561 = vmatprep.subr.bf16.mxu0 %v631_v28 }
  0x1e   :  { %589 = vmatprep.subr.bf16.mxu1 %v632_v29 }
  0x20   :  { %562 = vmatpush3.bf16.msra.mxu0 %v633_v30 }
  0x21   :  { %590 = vmatpush3.bf16.msra.mxu1 %v634_v31 }
  0x23   :  { %355 = vmatmul.mubr.bf16.vlgmr.msra.gmra.mxu0 %v635_v32 }
  0x24   :  { %404 = vmatmul.mubr.bf16.vlgmr.msra.gmra.mxu1 %v638_v34  ;;  %362 = vmatprep.mubr.bf16.mxu0 %v641_v36 }
  0x25   :  { %411 = vmatprep.mubr.bf16.mxu1 %v643_v37 }
  0x2b   :  { %363 = vmatmul.mubr.bf16.gmra.mxu0 %v645_v38 }
  0x2c   :  { %412 = vmatmul.mubr.bf16.gmra.mxu1 %v646_v39 }
  0xe3   :  { %v563_v40 = vpop.f32.mrf.mxu0 }
  0xe4   :  { %v591_v41 = vpop.f32.mrf.mxu1 }
  0xe5   :  { %v564_v42 = vpop.f32.mrf.mxu0 }
  0xe6   :  { %v565_v43 = vadd.f32 %v564_v42, %v563_v40  ;;  %v592_v44 = vpop.f32.mrf.mxu1 }
  0xe7   :  { %v593_v45 = vadd.f32 %v592_v44, %v591_v41  ;;  %v566_v46 = vpop.f32.mrf.mxu0 }
  0xe8   :  { %v594_v48 = vpop.f32.mrf.mxu1 }
  0xe9   :  { %v406_v49 = vadd.f32 %v593_v45, %v565_v43  ;;  %v567_v50 = vpop.f32.mrf.mxu0 }
  0xea   :  { %v568_v52 = vadd.f32 %v567_v50, %v566_v46  ;;  %v595_v53 = vpop.f32.mrf.mxu1 }
  0xeb   :  { %v427_v54 = vmul.f32 %v526_v47, %v406_v49  ;;  %v596_v55 = vadd.f32 %v595_v53, %v594_v48  ;;  %v569_v56 = vpop.f32.mrf.mxu0 }
  0xec   :  { %v597_v57 = vpop.f32.mrf.mxu1 }
  0xed   :  { %v438_v58 = vadd.f32 %v527_v51, %v427_v54  ;;  %v409_v59 = vadd.f32 %v596_v55, %v568_v52  ;;  %v570_v60 = vpop.f32.mrf.mxu0 }
  0xee   :  { %v571_v61 = vadd.f32 %v570_v60, %v569_v56  ;;  %v598_v62 = vpop.f32.mrf.mxu1 }
  0xef   :  { %v446_v63 = vmul.f32 0.70710677, %v438_v58  ;;  %v428_v0 = vmul.f32 %v526_v47, %v409_v59  ;;  %v599_v1 = vadd.f32 %v598_v62, %v597_v57  ;;  %v572_v2 = vpop.f32.mrf.mxu0  ;;  %v442_v21 = vmul.f32 0.5, %v438_v58 }
  0xf0   :  { %v600_v3 = vpop.f32.mrf.mxu1 }
  0xf1   :  { %647 = verf.f32 %v446_v63  ;;  %v439_v4 = vadd.f32 %v527_v51, %v428_v0  ;;  %v414_v5 = vadd.f32 %v599_v1, %v571_v61  ;;  %v573_v6 = vpop.f32.mrf.mxu0 }
  0xf2   :  { %v574_v7 = vadd.f32 %v573_v6, %v572_v2  ;;  %v601_v8 = vpop.f32.mrf.mxu1 }
  0xf3   :  { %v447_v9 = vmul.f32 0.70710677, %v439_v4  ;;  %v429_v10 = vmul.f32 %v526_v47, %v414_v5  ;;  %v602_v11 = vadd.f32 %v601_v8, %v600_v3  ;;  %v443_v22 = vmul.f32 0.5, %v439_v4 }
  0xf5   :  { %649 = verf.f32 %v447_v9  ;;  %v440_v12 = vadd.f32 %v527_v51, %v429_v10  ;;  %v417_v13 = vadd.f32 %v602_v11, %v574_v7 }
  0xf7   :  { %v448_v14 = vmul.f32 0.70710677, %v440_v12  ;;  %v430_v15 = vmul.f32 %v526_v47, %v417_v13  ;;  %v444_v30 = vmul.f32 0.5, %v440_v12 }
  0xf9   :  { %651 = verf.f32 %v448_v14  ;;  %v441_v16 = vadd.f32 %v527_v51, %v430_v15 }
  0xfb   :  { %v449_v17 = vmul.f32 0.70710677, %v441_v16  ;;  %v445_v31 = vmul.f32 0.5, %v441_v16 }
  0xfd   :  { %653 = verf.f32 %v449_v17 }
  0xfe   :  { %v648_v18 = vpop.eup %647 }
  0xff   :  { %v454_v19 = vadd.f32 1.0, %v648_v18 }
 0x101   :  { %v458_v24 = vmul.f32 %v454_v19, %v442_v21 }
 0x102   :  { %v650_v20 = vpop.eup %649 }
 0x103   :  { %v455_v23 = vadd.f32 1.0, %v650_v20 }
 0x105   :  { %v459_v25 = vmul.f32 %v455_v23, %v443_v22 }
 0x106   :  { %v652_v26 = vpop.eup %651 }
 0x107   :  { %v539_v27 = vpack.c.bf16 %v459_v25, %v458_v24  ;;  %v456_v28 = vadd.f32 1.0, %v652_v26 }
 0x109   :  { %540 = vst [vmem:[%s816_s4] sm:$0xff] %v539_v27   ;;  %v460_v33 = vmul.f32 %v456_v28, %v444_v30 }
 0x10a   :  { %v654_v29 = vpop.eup %653 }
 0x10b   :  { %v457_v32 = vadd.f32 1.0, %v654_v29 }
 0x10d   :  { %v461_v34 = vmul.f32 %v457_v32, %v445_v31 }
 0x10f   :  { %v544_v35 = vpack.c.bf16 %v461_v34, %v460_v33 }
 0x111   :  { %546 = vst [vmem:[%s816_s4 + $0x8] sm:$0xff] %v544_v35  }

// kernel: vit_forward.5
= control target key start
LH: loop header
LB: loop body
LE: loop exit
PB: predicated region body
PF: predicated region fallthrough
CT: control target
= control target key end

     0   :  { %s3518_s25 = smov 0   ;;  %s3520_s26 = smov 0   ;;  %s4015_s0 = inlined_call_operand.vmem [shape: bf16[2,4,512], index: 0, kind: input, shape index: {}]   ;;  %s4016_s1 = inlined_call_operand.vmem [shape: bf16[512,128], index: 1, kind: input, shape index: {}]   ;;  %s4017_s2 = inlined_call_operand.vmem [shape: f32[1,128], index: 2, kind: input, shape index: {}]   ;;  %s4018_s3 = inlined_call_operand.vmem [shape: f32[4,128], index: 3, kind: input, shape index: {}]   ;;  %s4019_s4 = inlined_call_operand.vmem [shape: f32[1,128], index: 4, kind: input, shape index: {}]   ;;  %s4020_s5 = inlined_call_operand.vmem [shape: f32[2,1,128], index: 5, kind: input, shape index: {}]   ;;  %s4021_s6 = inlined_call_operand.vmem [shape: f32[2,1,128], index: 6, kind: input, shape index: {}]   ;;  %s4022_s7 = inlined_call_operand.vmem [shape: bf16[2,128,384], index: 7, kind: input, shape index: {}]   ;;  %s4023_s8 = inlined_call_operand.vmem [shape: f32[2,1,384], index: 8, kind: input, shape index: {}]   ;;  %s4024_s9 = inlined_call_operand.vmem [shape: bf16[2,128,128], index: 9, kind: input, shape index: {}]   ;;  %s4025_s10 = inlined_call_operand.vmem [shape: f32[2,1,128], index: 10, kind: input, shape index: {}]   ;;  %s4026_s11 = inlined_call_operand.vmem [shape: f32[2,1,128], index: 11, kind: input, shape index: {}]   ;;  %s4027_s12 = inlined_call_operand.vmem [shape: f32[2,1,128], index: 12, kind: input, shape index: {}]   ;;  %s4028_s13 = inlined_call_operand.vmem [shape: bf16[2,128,256], index: 13, kind: input, shape index: {}]   ;;  %s4029_s14 = inlined_call_operand.vmem [shape: f32[2,1,256], index: 14, kind: input, shape index: {}]   ;;  %s4030_s15 = inlined_call_operand.vmem [shape: bf16[2,256,128], index: 15, kind: input, shape index: {}]   ;;  %s4031_s16 = inlined_call_operand.vmem [shape: f32[2,1,128], index: 16, kind: input, shape index: {}]   ;;  %s4032_s17 = inlined_call_operand.vmem [shape: f32[1,128], index: 17, kind: input, shape index: {}]   ;;  %s4033_s18 = inlined_call_operand.vmem [shape: f32[1,128], index: 18, kind: input, shape index: {}]   ;;  %s4034_s19 = inlined_call_operand.vmem [shape: bf16[128,128], index: 19, kind: input, shape index: {}]   ;;  %s4035_s20 = inlined_call_operand.vmem [shape: f32[1,128], index: 20, kind: input, shape index: {}]   ;;  %s4036_s21 = inlined_call_operand.vmem [shape: f32[2,8,128], index: 21, kind: output, shape index: {}]  }
   0x1   :  { %4044 = sst [smem:[#allocation9_spill]] %s4015_s0  ;;  %s3522_s27 = smov 0  }
   0x2   :  { %4045 = sst [smem:[#allocation10_spill]] %s4016_s1 }
   0x3   :  { %4046 = sst [smem:[#allocation11_spill]] %s4017_s2  ;;  %s3516_s2 = smov 0  }
   0x4   :  { %4047 = sst [smem:[#allocation12_spill]] %s4018_s3  ;;  %s3524_s3 = smov 0  }
   0x5   :  { %4048 = sst [smem:[#allocation13_spill]] %s4019_s4 }
   0x6   :  { %4049 = sst [smem:[#allocation14_spill]] %s4020_s5 }
   0x7   :  { %4050 = sst [smem:[#allocation15_spill]] %s4021_s6 }
   0x8   :  { %4051 = sst [smem:[#allocation16_spill]] %s4022_s7 }
   0x9   :  { %4052 = sst [smem:[#allocation17_spill]] %s4023_s8 }
   0xa   :  { %4053 = sst [smem:[#allocation18_spill]] %s4024_s9 }
   0xb   :  { %4054 = sst [smem:[#allocation19_spill]] %s4032_s17 }
   0xc   :  { %4055 = sst [smem:[#allocation20_spill]] %s4033_s18 }
   0xd   :  { %4056 = sst [smem:[#allocation21_spill]] %s4034_s19 }
   0xe   :  { %4057 = sst [smem:[#allocation22_spill]] %s4035_s20 }
   0xf LB: > { %4058 = sst [smem:[#allocation3_spill]] %s3389_s26  ;;  %s40_s28 = sadd.s32 1, %s3389_s26  ;;  %s3397_s3 = sphi %s3524_s3, %s31_s3   ;;  %s3393_s27 = sphi %s3522_s27, %s4092_s27   ;;  %s3389_s26 = sphi %s3520_s26, %s4091_s26   ;;  %s3385_s25 = sphi %s3518_s25, %s4090_s25   ;;  %s3381_s2 = sphi %s3516_s2, %s4089_s2  }
  0x10   : > { %4059 = sst [smem:[#allocation4_spill]] %s3393_s27  ;;  %s43_s29 = sadd.s32 1, %s3393_s27 }
  0x11   : > { %4060 = sst [smem:[#allocation5_spill]] %s3397_s3  ;;  %p41_p0 = scmp.ge.s32.totalorder %s40_s28, 2 }
  0x12   : > { %p2802_p1 = scmp.ge.s32.totalorder %s3397_s3, 1  ;;  %p705_p2 = scmp.lt.s32.totalorder %s3397_s3, 5 }
  0x13   : > { %s4094_s28 = smov (%p41_p0, %s40_s28), 0  ;;  %s4096_s29 = smov (!%p41_p0, %s43_s29), %s3393_s27 }
  0x14   : > { %4061 = sst [smem:[#allocation6_spill]] %s4094_s28  ;;  %p706_p3 = pnand %p2802_p1, %p705_p2 }
  0x15   : > { %p45_p4 = scmp.ge.s32.totalorder %s4096_s29, 2 }
  0x16   : > { %709 = sbr.rel (%p706_p3) target bundleno = 2993 (0xbb1), region = 104 }
  0x17   : > { %s4098_s29 = smov (%p45_p4, %s4096_s29), 0 }
  0x18   : > { %4062 = sst [smem:[#allocation7_spill]] %s4098_s29 }
  0x1b   : > { %p810_p5 = scmp.lt.s32.totalorder %s3385_s25, 1  ;;  %p815_p6 = scmp.lt.s32.totalorder %s3381_s2, 1  ;;  %v866_v0 = vlaneseq  ;;  %v3399_v3 = vmov 0.0   ;;  %v3400_v8 = vmov -1e+30  }
  0x1c   : > { %s4063_s22 = sld [smem:[#allocation9_spill]]  ;;  %p2820_p7 = scmp.ne.s32.totalorder %s3381_s2, 0 }
  0x1d   : > { %s4100_s25 = smov (!%p810_p5, %s3385_s25), 1  ;;  %v867_v1 = vand.u32 127, %v866_v0  ;;  %v3551_v2 = vshrl.u32 %v866_v0, 7  ;;  %s4066_s7 = sld [smem:[#allocation16_spill]] }
  0x1e   : > { %s3554_s0 = scalar_select %p815_p6, %s3381_s2, 1 }
  0x1f   : > { %s4038_s4 = sshll.u32 %s4100_s25, 3  ;;  %vm868_vm0 = vcmp.lt.s32.totalorder %v867_v1, 64  ;;  %vm872_vm1 = vcmp.lt.s32.totalorder %v867_v1, 16  ;;  %vm876_vm2 = vcmp.ge.s32.totalorder %v867_v1, 16  ;;  %vm877_vm3 = vcmp.lt.s32.totalorder %v867_v1, 32  ;;  %s4067_s9 = sld [smem:[#allocation18_spill]] }
  0x20   : > { %v3570_v4 = vsel %vm868_vm0, 1.0, %v3399_v3  ;;  %v3573_v5 = vsel %vm872_vm1, 1.0, %v3399_v3  ;;  %vm878_vm4 = vmand %vm876_vm2, %vm877_vm3  ;;  %vm881_vm5 = vcmp.ge.s32.totalorder %v867_v1, 32  ;;  %vm882_vm6 = vcmp.lt.s32.totalorder %v867_v1, 48  ;;  %s3164_s29 = smul.u32 3, %s3554_s0  ;;  %s2943_s1 = sshll.u32 %s3554_s0, 6 }
  0x21   : > { %v3581_v6 = vsel %vm878_vm4, 1.0, %v3399_v3  ;;  %vm883_vm7 = vmand %vm881_vm5, %vm882_vm6  ;;  %vm886_vm8 = vcmp.ge.s32.totalorder %v867_v1, 48  ;;  %vm890_vm9 = vcmp.lt.s32.totalorder %v867_v1, 5  ;;  %vm894_vm10 = vcmp.lt.s32.totalorder %v3551_v2, 5  ;;  %s4069_s8 = sld [smem:[#allocation17_spill]]  ;;  %s860_s28 = scalar_lea.vmem %s4031_s16, %s3554_s0 }
  0x22   : > { %s3562_s23 = scalar_lea.vmem %s4063_s22, %s4038_s4  ;;  %s3163_s4 = smul.u32 192, %s3554_s0  ;;  %v3587_v7 = vsel %vm883_vm7, 1.0, %v3399_v3  ;;  %vm887_vm11 = vmand %vm886_vm8, %vm868_vm0  ;;  %v3590_v9 = vsel %vm890_vm9, 0.0, %v3400_v8  ;;  %v3593_v10 = vsel %vm894_vm10, 1.0, %v3399_v3 }
  0x23   : > { %v3606_v11 = vsel %vm887_vm11, 1.0, %v3399_v3  ;;  %s4070_s22 = sshll.u32 %s4100_s25, 3  ;;  %s4071_s3 = sld [smem:[#allocation10_spill]] (!%p2820_p7) }
  0x24   : > { %s3598_s5 = scalar_lea.vmem %s4066_s7, %s3163_s4  ;;  %s3651_s6 = scalar_lea.vmem %s4036_s21, %s4070_s22 }
  0x25   : > { %s3603_s27 = scalar_lea.vmem %s4067_s9, %s2943_s1  ;;  %s2944_s1 = sshll.u32 %s3554_s0, 7 }
  0x26   : > { %4068 = sst [smem:[#allocation8_spill]] %s3603_s27  ;;  %s2810_s9 = sshll.u32 %s3554_s0, 1 }
  0x27   : > { %s3611_s20 = scalar_lea.vmem %s4069_s8, %s3164_s29  ;;  %s3630_s26 = scalar_lea.vmem %s4028_s13, %s2944_s1 }
  0x28   : > { %s3635_s17 = scalar_lea.vmem %s4029_s14, %s2810_s9  ;;  %s3640_s24 = scalar_lea.vmem %s4030_s15, %s2944_s1 }
  0x29   : > { %900 = sbr.rel (%p2820_p7) target bundleno = 288 (0x120), region = 108  ;;  %s4072_s29 = smov (!%p2820_p7), %s4071_s3 }
  0x2a   : > { %s4074_s30 = sld [smem:[#allocation12_spill]] (!%p2820_p7) }
  0x2b   : > { %s4075_s9 = sld [smem:[#allocation13_spill]] (!%p2820_p7) }
  0x2e   : > { %v3212_v12 = vld [vmem:[%s4071_s3 + $0x78] sm:$0xff]   ;;  %v3216_v16 = vld [vmem:[%s4072_s29 + $0x70] sm:$0xff]   ;;  %v3220_v20 = vld [vmem:[%s4072_s29 + $0x68] sm:$0xff]   ;;  %v3401_v45 = vmov 1983009808   ;;  %vm1273_vm12 = vcmask 1040384  }
  0x2f   : > { %v3213_v13 = vld [vmem:[%s4072_s29 + $0xf8] sm:$0xff]   ;;  %2946 = vmatprep.subr.bf16.mxu0 %v3212_v12  ;;  %v3217_v17 = vld [vmem:[%s4072_s29 + $0xf0] sm:$0xff]   ;;  %v3221_v21 = vld [vmem:[%s4072_s29 + $0xe8] sm:$0xff]   ;;  %v976_v46 = vunpack.c.l.s4 %v3401_v45  ;;  %vm1275_vm13 = vcmask 1044480  }
  0x30   : > { %v3214_v14 = vld [vmem:[%s4072_s29 + $0x38] sm:$0xff]   ;;  %2968 = vmatprep.subr.bf16.mxu1 %v3213_v13  ;;  %v3218_v18 = vld [vmem:[%s4072_s29 + $0x30] sm:$0xff]   ;;  %v3222_v22 = vld [vmem:[%s4072_s29 + $0x28] sm:$0xff]  }
  0x31   : > { %v3215_v15 = vld [vmem:[%s4072_s29 + $0xb8] sm:$0xff]   ;;  %2947 = vmatpush3.bf16.msra.mxu0 %v3214_v14  ;;  %v3219_v19 = vld [vmem:[%s4072_s29 + $0xb0] sm:$0xff]   ;;  %v3223_v23 = vld [vmem:[%s4072_s29 + $0xa8] sm:$0xff]   ;;  %v977_v47 = vunpack.c.0.s8 %v976_v46 }
  0x32   : > { %2969 = vmatpush3.bf16.msra.mxu1 %v3215_v15  ;;  %2948 = vmatprep.subr.bf16.mxu0 %v3216_v16  ;;  %v3224_v24 = vld [vmem:[%s4072_s29 + $0x60] sm:$0xff]   ;;  %v3228_v28 = vld [vmem:[%s4072_s29 + $0x58] sm:$0xff]   ;;  %v3232_v32 = vld [vmem:[%s4072_s29 + $0x50] sm:$0xff]  }
  0x33   : > { %2970 = vmatprep.subr.bf16.mxu1 %v3217_v17  ;;  %v3225_v25 = vld [vmem:[%s4072_s29 + $0xe0] sm:$0xff]   ;;  %v3229_v29 = vld [vmem:[%s4072_s29 + $0xd8] sm:$0xff]   ;;  %v3233_v33 = vld [vmem:[%s4072_s29 + $0xd0] sm:$0xff]   ;;  %v980_v49 = vsub.s32 %v977_v47, %v3551_v2 }
  0x34   : > { %v3226_v26 = vld [vmem:[%s4072_s29 + $0x20] sm:$0xff]   ;;  %v3230_v30 = vld [vmem:[%s4072_s29 + $0x18] sm:$0xff]   ;;  %v3234_v34 = vld [vmem:[%s4072_s29 + $0x10] sm:$0xff]  }
  0x35   : > { %2949 = vmatpush3.bf16.msra.mxu0 %v3218_v18  ;;  %v3227_v27 = vld [vmem:[%s4072_s29 + $0xa0] sm:$0xff]   ;;  %v3231_v31 = vld [vmem:[%s4072_s29 + $0x98] sm:$0xff]   ;;  %v3235_v35 = vld [vmem:[%s4072_s29 + $0x90] sm:$0xff]  }
  0x36   : > { %2971 = vmatpush3.bf16.msra.mxu1 %v3219_v19  ;;  %2950 = vmatprep.subr.bf16.mxu0 %v3220_v20  ;;  %v3236_v36 = vld [vmem:[%s4072_s29 + $0x48] sm:$0xff]   ;;  %v3240_v40 = vld [vmem:[%s4072_s29 + $0x40] sm:$0xff]  }
  0x37   : > { %2972 = vmatprep.subr.bf16.mxu1 %v3221_v21  ;;  %v3237_v37 = vld [vmem:[%s4072_s29 + $0xc8] sm:$0xff]   ;;  %v3241_v41 = vld [vmem:[%s4072_s29 + $0xc0] sm:$0xff]  }
  0x38   : > { %v3238_v38 = vld [vmem:[%s4072_s29 + $0x8] sm:$0xff]   ;;  %v3242_v42 = vld [vmem:[%s4072_s29] sm:$0xff]  }
  0x39   : > { %2951 = vmatpush3.bf16.msra.mxu0 %v3222_v22  ;;  %v3239_v39 = vld [vmem:[%s4072_s29 + $0x88] sm:$0xff]   ;;  %v3243_v43 = vld [vmem:[%s4072_s29 + $0x80] sm:$0xff]  }
  0x3a   : > { %2973 = vmatpush3.bf16.msra.mxu1 %v3223_v23  ;;  %2952 = vmatprep.subr.bf16.mxu0 %v3224_v24  ;;  %v901_v44 = vld [vmem:[%s3562_s23] sm:$0xff]  ;;  %s4073_s23 = sld [smem:[#allocation11_spill]] }
  0x3b   : > { %2974 = vmatprep.subr.bf16.mxu1 %v3225_v25  ;;  %v974_v48 = vcombine.high %v901_v44, %v901_v44  ;;  %v981_v50 = vrot.slane %v901_v44, %v980_v49  ;;  %v1267_v0 = vld [vmem:[%s4074_s30] sm:$0xf] }
  0x3c   : > { %v1269_v14 = vld [vmem:[%s4075_s9] sm:$0x1] }
  0x3d   : > { %2953 = vmatpush3.bf16.msra.mxu0 %v3226_v26  ;;  %v988_v51 = vrot.slane %v974_v48, %v980_v49  ;;  %v989_v52 = vcombine.high %v981_v50, %v981_v50 }
  0x3e   : > { %2975 = vmatpush3.bf16.msra.mxu1 %v3227_v27  ;;  %2954 = vmatprep.subr.bf16.mxu0 %v3228_v28 }
  0x3f   : > { %2976 = vmatprep.subr.bf16.mxu1 %v3229_v29  ;;  %v990_v53 = vcombine.high %v988_v51, %v988_v51  ;;  %1219 = vmatprep.mubr.bf16.mxu0 %v989_v52 }
  0x40   : > { %v2821_v56 = vld [vmem:[%s4073_s23] ss:$0 sm:$0xff] }
  0x41   : > { %2955 = vmatpush3.bf16.msra.mxu0 %v3230_v30  ;;  %1259 = vmatprep.mubr.bf16.mxu1 %v990_v53 }
  0x42   : > { %2977 = vmatpush3.bf16.msra.mxu1 %v3231_v31  ;;  %2956 = vmatprep.subr.bf16.mxu0 %v3232_v32 }
  0x43   : > { %2978 = vmatprep.subr.bf16.mxu1 %v3233_v33 }
  0x45   : > { %2957 = vmatpush3.bf16.msra.mxu0 %v3234_v34 }
  0x46   : > { %2979 = vmatpush3.bf16.msra.mxu1 %v3235_v35  ;;  %2958 = vmatprep.subr.bf16.mxu0 %v3236_v36 }
  0x47   : > { %2980 = vmatprep.subr.bf16.mxu1 %v3237_v37 }
  0x49   : > { %2959 = vmatpush3.bf16.msra.mxu0 %v3238_v38 }
  0x4a   : > { %2981 = vmatpush3.bf16.msra.mxu1 %v3239_v39  ;;  %2960 = vmatprep.subr.bf16.mxu0 %v3240_v40 }
  0x4b   : > { %2982 = vmatprep.subr.bf16.mxu1 %v3241_v41 }
  0x4d   : > { %2961 = vmatpush3.bf16.msra.mxu0 %v3242_v42 }
  0x4e   : > { %2983 = vmatpush3.bf16.msra.mxu1 %v3243_v43 }
  0x50   : > { %1220 = vmatmul.mubr.bf16.vlgmr.msra.gmra.mxu0 %v981_v50 }
  0x51   : > { %1260 = vmatmul.mubr.bf16.vlgmr.msra.gmra.mxu1 %v988_v51 }
 0x110   : > { %v2962_v54 = vpop.f32.mrf.mxu0 }
 0x111   : > { %v2984_v55 = vpop.f32.mrf.mxu1 }
 0x112   : > { %v2963_v57 = vpop.f32.mrf.mxu0 }
 0x113   : > { %v2985_v58 = vpop.f32.mrf.mxu1  ;;  %v2964_v59 = vadd.f32 %v2963_v57, %v2962_v54 }
 0x114   : > { %v2965_v60 = vpop.f32.mrf.mxu0  ;;  %v2986_v63 = vadd.f32 %v2985_v58, %v2984_v55 }
 0x115   : > { %v2987_v61 = vpop.f32.mrf.mxu1  ;;  %v1222_v62 = vadd.f32 %v2964_v59, %v2821_v56 }
 0x116   : > { %v2966_v1 = vpop.f32.mrf.mxu0 }
 0x117   : > { %v2988_v8 = vpop.f32.mrf.mxu1  ;;  %v1262_v12 = vadd.f32 %v2986_v63, %v1222_v62 }
 0x119   : > { %v1268_v13 = vadd.f32 %v1267_v0, %v1262_v12 }
 0x11b   : > { %v1271_v15 = vrot.slane %v1268_v13, 7 }
 0x11d   : > { %v1274_v16 = vsel %vm1273_vm12, %v1269_v14, %v1271_v15 }
 0x11e   : > { %v1276_v17 = vsel %vm1275_vm13, %v1274_v16, 0.0 }
 0x11f   : > { %1277 = vst [vmem:[#allocation2] sm:$0xff] %v1276_v17 }
 0x120 PF: > { %3055 = vmatprep.subr.bf16.mxu1 %v3399_v3  ;;  %v3245_v19 = vld [vmem:[%s3598_s5 + $0xac] ss:$12 sps:$4 sm:$0xff]   ;;  %v3247_v20 = vld [vmem:[%s3598_s5 + $0xa8] ss:$12 sps:$4 sm:$0xff]   ;;  %v3248_v21 = vld [vmem:[%s3598_s5 + $0xb0] ss:$12 sps:$4 sm:$0xff]   ;;  %s4081_s30 = scalar_lea.vmem %s4025_s10, %s3554_s0  ;;  %s4082_s9 = scalar_lea.vmem %s4026_s11, %s3554_s0 }
 0x121   : > { %v3249_v22 = vld [vmem:[%s3598_s5 + $0x94] ss:$12 sps:$4 sm:$0xff]   ;;  %v3251_v23 = vld [vmem:[%s3598_s5 + $0x90] ss:$12 sps:$4 sm:$0xff]   ;;  %v3252_v24 = vld [vmem:[%s3598_s5 + $0x98] ss:$12 sps:$4 sm:$0xff]   ;;  %1485 = vmatprep.subr.bf16.mxu0 %v3245_v19  ;;  %3056 = vmatpush3.bf16.msra.mxu1 %v3248_v21  ;;  %s4083_s3 = scalar_lea.vmem %s4027_s12, %s3554_s0 }
 0x122   : > { %1486 = vmatpush1.bf16.msra.mxu0 %v3247_v20  ;;  %3057 = vmatprep.subr.bf16.mxu1 %v3399_v3  ;;  %v3253_v30 = vld [vmem:[%s3598_s5 + $0x7c] ss:$12 sps:$4 sm:$0xff]   ;;  %v3255_v31 = vld [vmem:[%s3598_s5 + $0x78] ss:$12 sps:$4 sm:$0xff]   ;;  %v3256_v32 = vld [vmem:[%s3598_s5 + $0x80] ss:$12 sps:$4 sm:$0xff]  }
 0x123   : > { %1487 = vmatprep.subr.bf16.mxu0 %v3249_v22  ;;  %v3257_v33 = vld [vmem:[%s3598_s5 + $0x64] ss:$12 sps:$4 sm:$0xff]   ;;  %v3259_v34 = vld [vmem:[%s3598_s5 + $0x60] ss:$12 sps:$4 sm:$0xff]   ;;  %v3260_v35 = vld [vmem:[%s3598_s5 + $0x68] ss:$12 sps:$4 sm:$0xff]  }
 0x124   : > { %v3261_v36 = vld [vmem:[%s3598_s5 + $0x4c] ss:$12 sps:$4 sm:$0xff]   ;;  %v3263_v37 = vld [vmem:[%s3598_s5 + $0x48] ss:$12 sps:$4 sm:$0xff]   ;;  %v3264_v38 = vld [vmem:[%s3598_s5 + $0x50] ss:$12 sps:$4 sm:$0xff]  }
 0x125   : > { %3058 = vmatpush3.bf16.msra.mxu1 %v3252_v24  ;;  %v3265_v39 = vld [vmem:[%s3598_s5 + $0x34] ss:$12 sps:$4 sm:$0xff]   ;;  %v3402_v40 = vmov 0   ;;  %vm3403_vm14 = vmmov 0   ;;  %v3267_v41 = vld [vmem:[%s3598_s5 + $0x30] ss:$12 sps:$4 sm:$0xff]  }
 0x126   : > { %v3761_v18 = vld [vmem:[#allocation2] sm:$0xff]  ;;  %1488 = vmatpush1.bf16.msra.mxu0 %v3251_v23  ;;  %3059 = vmatprep.subr.bf16.mxu1 %v3399_v3  ;;  %v3269_v43 = vld [vmem:[%s3598_s5 + $0x1c] ss:$12 sps:$4 sm:$0xff]   ;;  %s4076_s19 = sld [smem:[#allocation14_spill]]  ;;  %v1352_v59 = vsub.s32 2, %v3551_v2  ;;  %v1348_v61 = vsub.s32 1, %v3551_v2 }
 0x127   : > { %1281 = vadd.xlane.f32.xlu0 %v3761_v18  ;;  %1489 = vmatprep.subr.bf16.mxu0 %v3253_v30  ;;  %v3268_v42 = vld [vmem:[%s3598_s5 + $0x38] ss:$12 sps:$4 sm:$0xff]   ;;  %v3272_v45 = vld [vmem:[%s3598_s5 + $0x20] ss:$12 sps:$4 sm:$0xff]   ;;  %v3276_v48 = vld [vmem:[%s3598_s5 + $0x8] ss:$12 sps:$4 sm:$0xff]  }
 0x128   : > { %1517 = vmatprep.mubr.bf16.mxu0 %v3402_v40  ;;  %3071 = vmatprep.mubr.msk.bf16.mxu1 %vm3403_vm14, %v3399_v3  ;;  %v3271_v44 = vld [vmem:[%s3598_s5 + $0x18] ss:$12 sps:$4 sm:$0xff]   ;;  %v3275_v47 = vld [vmem:[%s3598_s5] ss:$12 sps:$4 sm:$0xff]   ;;  %s4078_s4 = sld [smem:[#allocation15_spill]]  ;;  %v1344_v63 = vsub.s32 0, %v3551_v2 }
 0x129   : > { %3060 = vmatpush3.bf16.msra.mxu1 %v3256_v32  ;;  %v3273_v46 = vld [vmem:[%s3598_s5 + $0x4] ss:$12 sps:$4 sm:$0xff]   ;;  %v1340_v60 = vld [vmem:[%s3611_s20] sm:$0x7]  ;;  %vm1684_vm15 = vcmask 1043456   ;;  %vm1610_vm0 = vcmask 64512  }
 0x12a   : > { %1490 = vmatpush1.bf16.msra.mxu0 %v3255_v31  ;;  %3061 = vmatprep.subr.bf16.mxu1 %v3399_v3  ;;  %v1353_v62 = vrot.slane %v1340_v60, %v1352_v59  ;;  %v1349_v0 = vrot.slane %v1340_v60, %v1348_v61  ;;  %v1345_v13 = vrot.slane %v1340_v60, %v1344_v63  ;;  %s4080_s20 = sld [smem:[#allocation8_spill]]  ;;  %p2928_p8 = scmp.ne.s32.totalorder %s3381_s2, 1 }
 0x12b   : > { %1491 = vmatprep.subr.bf16.mxu0 %v3257_v33  ;;  %s4087_s2 = sld [smem:[#allocation22_spill]] (!%p2928_p8) }
 0x12c   : > { %s4077_s1 = scalar_lea.vmem %s4076_s19, %s3554_s0 }
 0x12d   : > { %3062 = vmatpush3.bf16.msra.mxu1 %v3260_v35  ;;  %v2854_v53 = vld [vmem:[%s4077_s1] ss:$0 sm:$0xff]  ;;  %s4086_s1 = sld [smem:[#allocation20_spill]] (!%p2928_p8) }
 0x12e   : > { %1492 = vmatpush1.bf16.msra.mxu0 %v3259_v34  ;;  %3063 = vmatprep.subr.bf16.mxu1 %v3399_v3  ;;  %s4079_s23 = scalar_lea.vmem %s4078_s4, %s3554_s0  ;;  %s4084_s0 = sld [smem:[#allocation21_spill]] (!%p2928_p8) }
 0x12f   : > { %1493 = vmatprep.subr.bf16.mxu0 %v3261_v36  ;;  %v2855_v55 = vld [vmem:[%s4079_s23] ss:$0 sm:$0xff] }
 0x131   : > { %3064 = vmatpush3.bf16.msra.mxu1 %v3264_v38 }
 0x132   : > { %1494 = vmatpush1.bf16.msra.mxu0 %v3263_v37  ;;  %3065 = vmatprep.subr.bf16.mxu1 %v3399_v3 }
 0x133   : > { %1495 = vmatprep.subr.bf16.mxu0 %v3265_v39 }
 0x135   : > { %3066 = vmatpush3.bf16.msra.mxu1 %v3268_v42 }
 0x136   : > { %1496 = vmatpush1.bf16.msra.mxu0 %v3267_v41  ;;  %3067 = vmatprep.subr.bf16.mxu1 %v3399_v3 }
 0x137   : > { %1497 = vmatprep.subr.bf16.mxu0 %v3269_v43 }
 0x139   : > { %3068 = vmatpush3.bf16.msra.mxu1 %v3272_v45 }
 0x13a   : > { %1498 = vmatpush1.bf16.msra.mxu0 %v3271_v44  ;;  %3069 = vmatprep.subr.bf16.mxu1 %v3399_v3 }
 0x13b   : > { %1499 = vmatprep.subr.bf16.mxu0 %v3273_v46 }
 0x13d   : > { %3070 = vmatpush3.bf16.msra.mxu1 %v3276_v48 }
 0x13e   : > { %1500 = vmatpush1.bf16.msra.mxu0 %v3275_v47  ;;  %3075 = vmatprep.subr.bf16.mxu1 %v3399_v3 }
 0x13f   : > { %3099 = vmatprep.subr.bf16.mxu0 %v3399_v3 }
 0x1b0   : > { %v1282_v25 = vpop.xlane.xlu0 %1281 }
 0x1b1   : > { %v1283_v26 = vmul.f32 0.015625, %v1282_v25 }
 0x1b3   : > { %v1284_v27 = vsub.f32 %v3761_v18, %v1283_v26 }
 0x1b5   : > { %v1285_v28 = vmul.f32 %v3570_v4, %v1284_v27 }
 0x1b7   : > { %v1286_v29 = vmul.f32 %v1285_v28, %v1285_v28 }
 0x1b9   : > { %1287 = vadd.xlane.f32.xlu0 %v1286_v29 }
 0x242   : > { %v1288_v49 = vpop.xlane.xlu0 %1287 }
 0x243   : > { %v1289_v50 = vmul.f32 0.015625, %v1288_v49 }
 0x245   : > { %v1290_v51 = vadd.f32 1e-05, %v1289_v50 }
 0x247   : > { %3325 = vrsqrt.f32 %v1290_v51 }
 0x254   : > { %v3326_v52 = vpop.eup %3325 }
 0x255   : > { %v1292_v54 = vmul.f32 %v3326_v52, %v1285_v28 }
 0x257   : > { %v1299_v56 = vmul.f32 %v2854_v53, %v1292_v54 }
 0x259   : > { %v1306_v57 = vadd.f32 %v2855_v55, %v1299_v56 }
 0x25b   : > { %v1307_v58 = vpack.c.bf16 %v1306_v57, %v1306_v57 }
 0x25d   : > { %1518 = vmatmul.mubr.bf16.vlgmr.msra.gmra.mxu0 %v1307_v58  ;;  %3072 = vmatmul.mubr.bf16.vlgmr.msra.gmra.mxu1 %v1307_v58 }
 0x25e   : > { %3077 = vmatprep.mubr.msk.bf16.mxu1 %vm3403_vm14, %v3399_v3  ;;  %3101 = vmatprep.mubr.msk.bf16.mxu0 %vm3403_vm14, %v3399_v3 }
 0x31d   : > { %v1519_v1 = vpop.f32.mrf.mxu0  ;;  %v1560_v8 = vpop.f32.mrf.mxu1 }
 0x31e   : > { %v1561_v12 = vadd.f32 %v1560_v8, %v1353_v62  ;;  %v1520_v25 = vadd.f32 %v1519_v1, %v1345_v13 }
 0x31f   : > { %v1521_v14 = vpop.f32.mrf.mxu0  ;;  %v3073_v15 = vpop.f32.mrf.mxu1 }
 0x320   : > { %v1522_v16 = vadd.f32 %v1521_v14, %v1349_v0  ;;  %v1623_v17 = vmul.f32 %v3573_v5, %v1561_v12  ;;  %v1828_v21 = vmul.f32 %v3587_v7, %v1561_v12  ;;  %v1931_v22 = vmul.f32 %v3606_v11, %v1561_v12 }
 0x321   : > { %v1523_v19 = vpop.f32.mrf.mxu0  ;;  %v1563_v20 = vpop.f32.mrf.mxu1  ;;  %v1679_v41 = vmul.f32 %v3581_v6, %v1561_v12 }
 0x322   : > { %v1568_v23 = vmul.f32 %v3573_v5, %v1522_v16  ;;  %v1774_v24 = vmul.f32 %v3587_v7, %v1522_v16  ;;  %v1624_v28 = vpack.c.bf16 %v1623_v17, %v1623_v17  ;;  %v1829_v29 = vpack.c.bf16 %v1828_v21, %v1828_v21 }
 0x323   : > { %v1524_v26 = vpop.f32.mrf.mxu0  ;;  %v3074_v27 = vpop.f32.mrf.mxu1  ;;  %v1932_v32 = vpack.c.bf16 %v1931_v22, %v1931_v22  ;;  %v1566_v7 = vmul.f32 0.25, %v1520_v25  ;;  %v1625_v35 = vmul.f32 %v3581_v6, %v1522_v16  ;;  %v1877_v36 = vmul.f32 %v3606_v11, %v1522_v16 }
 0x324   : > { %v1569_v30 = vpack.c.bf16 %v1568_v23, %v1568_v23  ;;  %v1775_v31 = vpack.c.bf16 %v1774_v24, %v1774_v24  ;;  %v3831_v33 = vsel %vm1684_vm15, %v1624_v28, 0  ;;  %v3834_v34 = vsel %vm1684_vm15, %v1829_v29, 0 }
 0x325   : > { %v3837_v5 = vsel %vm1684_vm15, %v1932_v32, 0  ;;  %v1567_v37 = vpack.c.bf16 %v1566_v7, %v1566_v7  ;;  %v1626_v38 = vpack.c.bf16 %v1625_v35, %v1625_v35  ;;  %v1878_v39 = vpack.c.bf16 %v1877_v36, %v1877_v36  ;;  %v3277_v7 = vld [vmem:[%s4080_s20 + $0x38] sm:$0xff]  }
 0x326   : > { %3076 = vmatpush3.bf16.xpose.msra.mxu1 %v1569_v30  ;;  %3100 = vmatpush3.bf16.xpose.msra.mxu0 %v1775_v31  ;;  %v1680_v11 = vpack.c.bf16 %v1679_v41, %v1679_v41 }
 0x327   : > { %3081 = vmatprep.subr.bf16.mxu1 %v3399_v3  ;;  %3111 = vmatprep.subr.bf16.mxu0 %v3399_v3 }
 0x328   : > { %v1686_v42 = vsel %vm1684_vm15, %v1680_v11, 0 }
 0x32d   : > { %3078 = vmatmul.mubr.bf16.vlgmr.msra.gmra.mxu1 %v1567_v37  ;;  %3102 = vmatmul.mubr.bf16.vlgmr.msra.gmra.mxu0 %v1567_v37 }
 0x32e   : > { %3082 = vmatpush3.bf16.xpose.msra.mxu1 %v1626_v38  ;;  %3112 = vmatpush3.bf16.xpose.msra.mxu0 %v1878_v39 }
 0x32f   : > { %3083 = vmatprep.mubr.msk.bf16.mxu1 %vm3403_vm14, %v3399_v3  ;;  %3113 = vmatprep.mubr.msk.bf16.mxu0 %vm3403_vm14, %v3399_v3 }
 0x330   : > { %3087 = vmatprep.subr.bf16.mxu1 %v3399_v3  ;;  %3123 = vmatprep.subr.bf16.mxu0 %v3399_v3 }
 0x335   : > { %3084 = vmatmul.mubr.bf16.vlgmr.msra.gmra.mxu1 %v1567_v37  ;;  %3114 = vmatmul.mubr.bf16.vlgmr.msra.gmra.mxu0 %v1567_v37 }
 0x336   : > { %3088 = vmatpush3.bf16.msra.mxu1 %v1686_v42  ;;  %3089 = vmatprep.mubr.msk.bf16.mxu1 %vm3403_vm14, %v3399_v3 }
 0x337   : > { %3093 = vmatprep.subr.bf16.mxu1 %v3399_v3  ;;  %3139 = vmatprep.mubr.msk.bf16.mxu0 %vm3403_vm14, %v3399_v3 }
 0x338   : > { %3124 = vmatpush3.bf16.msra.mxu0 %v3277_v7 }
 0x339   : > { %3125 = vmatprep.subr.bf16.mxu0 %v3399_v3 }
 0x3ed   : > { %v1604_v6 = vpop.f32.mrf.mxu1  ;;  %v1810_v43 = vpop.f32.mrf.mxu0 }
 0x3ee   : > { %v1811_v44 = vadd.f32 %v1810_v43, %v3590_v9  ;;  %v1605_v57 = vadd.f32 %v1604_v6, %v3590_v9 }
 0x3ef   : > { %v3079_v45 = vpop.f32.mrf.mxu1  ;;  %v3103_v46 = vpop.f32.mrf.mxu0 }
 0x3f0   : > { %v1816_v47 = vsel %vm1610_vm0, %v1811_v44, -inf  ;;  %v1611_v8 = vsel %vm1610_vm0, %v1605_v57, -inf }
 0x3f1   : > { %1817 = vmax.xlane.f32.xlu0 %v1816_v47  ;;  %v1607_v48 = vpop.f32.mrf.mxu1  ;;  %v1813_v49 = vpop.f32.mrf.mxu0 }
 0x3f2   : > { %v3278_v48 = vld [vmem:[%s4080_s20 + $0x30] sm:$0xff]   ;;  %v3279_v49 = vld [vmem:[%s4080_s20 + $0x28] sm:$0xff]  }
 0x3f3   : > { %v3080_v50 = vpop.f32.mrf.mxu1  ;;  %v3104_v51 = vpop.f32.mrf.mxu0  ;;  %3126 = vmatpush3.bf16.msra.mxu0 %v3278_v48 }
 0x3f4   : > { %3127 = vmatprep.subr.bf16.mxu0 %v3399_v3  ;;  %v3281_v50 = vld [vmem:[%s4080_s20 + $0x18] sm:$0xff]   ;;  %v3282_v51 = vld [vmem:[%s4080_s20 + $0x10] sm:$0xff]  }
 0x3f5   : > { %v1661_v52 = vpop.f32.mrf.mxu1  ;;  %v1913_v53 = vpop.f32.mrf.mxu0 }
 0x3f6   : > { %v1662_v54 = vadd.f32 %v1661_v52, %v3590_v9  ;;  %v1914_v1 = vadd.f32 %v1913_v53, %v3590_v9  ;;  %v3284_v52 = vld [vmem:[%s4080_s20] sm:$0xff]  }
 0x3f7   : > { %v3085_v55 = vpop.f32.mrf.mxu1  ;;  %v3115_v56 = vpop.f32.mrf.mxu0  ;;  %3128 = vmatpush3.bf16.msra.mxu0 %v3279_v49 }
 0x3f8   : > { %v1667_v58 = vsel %vm1610_vm0, %v1662_v54, -inf  ;;  %v1919_v12 = vsel %vm1610_vm0, %v1914_v1, -inf  ;;  %3129 = vmatprep.subr.bf16.mxu0 %v3399_v3 }
 0x3f9   : > { %v1916_v59 = vpop.f32.mrf.mxu0  ;;  %1668 = vmax.xlane.f32.xlu1 %v1667_v58  ;;  %v1664_v60 = vpop.f32.mrf.mxu1 }
 0x3fb   : > { %v3086_v62 = vpop.f32.mrf.mxu1  ;;  %v3116_v0 = vpop.f32.mrf.mxu0 }
 0x3fd   : > { %1612 = vmax.xlane.f32.xlu1 %v1611_v8 }
 0x401   : > { %1920 = vmax.xlane.f32.xlu1 %v1919_v12 }
 0x47a   : > { %v1818_v13 = vpop.xlane.xlu0 %1817 }
 0x47b   : > { %v1819_v14 = vsub.f32 %v1811_v44, %v1818_v13 }
 0x47d   : > { %v1820_v17 = vmul.f32 1.442695, %v1819_v14 }
 0x482   : > { %v1669_v15 = vpop.xlane.xlu1 %1668 }
 0x483   : > { %v1670_v16 = vsub.f32 %v1662_v54, %v1669_v15 }
 0x485   : > { %v1671_v19 = vmul.f32 1.442695, %v1670_v16 }
 0x486   : > { %v1613_v20 = vpop.xlane.xlu1 %1612 }
 0x487   : > { %3327 = vpow2.f32 %v1671_v19  ;;  %v1614_v21 = vsub.f32 %v1605_v57, %v1613_v20  ;;  %v2884_v20 = vld [vmem:[%s4081_s30] ss:$0 sm:$0xff] }
 0x488   : > { %3329 = vpow2.f32 %v1820_v17 }
 0x489   : > { %v1615_v22 = vmul.f32 1.442695, %v1614_v21 }
 0x48a   : > { %v1921_v23 = vpop.xlane.xlu1 %1920 }
 0x48b   : > { %3331 = vpow2.f32 %v1615_v22  ;;  %v1922_v9 = vsub.f32 %v1914_v1, %v1921_v23 }
 0x48d   : > { %v1923_v24 = vmul.f32 1.442695, %v1922_v9 }
 0x48f   : > { %3333 = vpow2.f32 %v1923_v24 }
 0x494   : > { %v3328_v25 = vpop.eup %3327 }
 0x495   : > { %v1673_v26 = vsel %vm1610_vm0, %v3328_v25, 0.0  ;;  %v3330_v27 = vpop.eup %3329 }
 0x496   : > { %1674 = vadd.xlane.f32.xlu0 %v1673_v26  ;;  %v1822_v29 = vsel %vm1610_vm0, %v3330_v27, 0.0  ;;  %v3285_v26 = vld [vmem:[%s3630_s26 + $0x70] ss:$8 sps:$4 sm:$0xff]  }
 0x498   : > { %v3332_v28 = vpop.eup %3331 }
 0x499   : > { %v1617_v30 = vsel %vm1610_vm0, %v3332_v28, 0.0 }
 0x49a   : > { %1823 = vadd.xlane.f32.xlu0 %v1822_v29  ;;  %1618 = vadd.xlane.f32.xlu1 %v1617_v30  ;;  %v3288_v29 = vld [vmem:[%s3630_s26 + $0x60] ss:$8 sps:$4 sm:$0xff]  }
 0x49c   : > { %v3334_v31 = vpop.eup %3333 }
 0x49d   : > { %v1925_v32 = vsel %vm1610_vm0, %v3334_v31, 0.0 }
 0x49e   : > { %1926 = vadd.xlane.f32.xlu1 %v1925_v32 }
 0x51f   : > { %v1675_v35 = vpop.xlane.xlu0 %1674 }
 0x520   : > { %3335 = vrcp.f32 %v1675_v35  ;;  %v3293_v35 = vld [vmem:[%s3630_s26 + $0x54] ss:$8 sps:$4 sm:$0xff]  }
 0x523   : > { %v1619_v36 = vpop.xlane.xlu1 %1618  ;;  %v1824_v37 = vpop.xlane.xlu0 %1823 }
 0x524   : > { %3337 = vrcp.f32 %v1619_v36  ;;  %v3291_v36 = vld [vmem:[%s3630_s26 + $0x50] ss:$8 sps:$4 sm:$0xff]  }
 0x525   : > { %3339 = vrcp.f32 %v1824_v37  ;;  %v3296_v37 = vld [vmem:[%s3630_s26 + $0x44] ss:$8 sps:$4 sm:$0xff]  }
 0x527   : > { %v1927_v11 = vpop.xlane.xlu1 %1926 }
 0x528   : > { %3341 = vrcp.f32 %v1927_v11  ;;  %v3302_v11 = vld [vmem:[%s3630_s26 + $0x24] ss:$8 sps:$4 sm:$0xff]  }
 0x52d   : > { %v3336_v38 = vpop.eup %3335 }
 0x52e   : > { %v1677_v39 = vmul.f32 %v3336_v38, %v3328_v25  ;;  %v3294_v38 = vld [vmem:[%s3630_s26 + $0x40] ss:$8 sps:$4 sm:$0xff]  }
 0x530   : > { %v1678_v41 = vpack.c.bf16 %v1677_v39, %v1677_v39  ;;  %v3299_v39 = vld [vmem:[%s3630_s26 + $0x34] ss:$8 sps:$4 sm:$0xff]  }
 0x531   : > { %v3338_v42 = vpop.eup %3337 }
 0x532   : > { %3090 = vmatmul.mubr.msk.bf16.vlgmr.msra.gmra.mxu1 %vm1610_vm0, %v1678_v41  ;;  %v1621_v6 = vmul.f32 %v3338_v42, %v3332_v28  ;;  %v3340_v44 = vpop.eup %3339  ;;  %v3290_v28 = vld [vmem:[%s3630_s26 + $0x64] ss:$8 sps:$4 sm:$0xff]   ;;  %v3297_v41 = vld [vmem:[%s3630_s26 + $0x30] ss:$8 sps:$4 sm:$0xff]   ;;  %v3300_v42 = vld [vmem:[%s3630_s26 + $0x20] ss:$8 sps:$4 sm:$0xff]  }
 0x533   : > { %3094 = vmatpush3.bf16.msra.mxu1 %v3831_v33  ;;  %3095 = vmatprep.mubr.msk.bf16.mxu1 %vm3403_vm14, %v3399_v3  ;;  %v1826_v33 = vmul.f32 %v3340_v44, %v3330_v27  ;;  %v3287_v27 = vld [vmem:[%s3630_s26 + $0x74] ss:$8 sps:$4 sm:$0xff]   ;;  %v3308_v44 = vld [vmem:[%s3630_s26 + $0x4] ss:$8 sps:$4 sm:$0xff]  }
 0x534   : > { %3105 = vmatprep.subr.bf16.mxu1 %v3399_v3  ;;  %v1622_v43 = vpack.c.bf16 %v1621_v6, %v1621_v6  ;;  %v3305_v6 = vld [vmem:[%s3630_s26 + $0x14] ss:$8 sps:$4 sm:$0xff]  }
 0x535   : > { %v1827_v45 = vpack.c.bf16 %v1826_v33, %v1826_v33  ;;  %v3342_v46 = vpop.eup %3341  ;;  %v3306_v33 = vld [vmem:[%s3630_s26] ss:$8 sps:$4 sm:$0xff]  }
 0x536   : > { %v1929_v47 = vmul.f32 %v3342_v46, %v3334_v31  ;;  %v3310_v46 = vld [vmem:[%s3640_s24 + $0x38] sm:$0xff]  }
 0x53a   : > { %3096 = vmatmul.mubr.msk.bf16.vlgmr.msra.gmra.mxu1 %vm1610_vm0, %v1622_v43  ;;  %v3303_v43 = vld [vmem:[%s3630_s26 + $0x10] ss:$8 sps:$4 sm:$0xff]  }
 0x53b   : > { %3106 = vmatpush3.bf16.msra.mxu1 %v3834_v34  ;;  %3107 = vmatprep.mubr.msk.bf16.mxu1 %vm3403_vm14, %v3399_v3  ;;  %v1930_v34 = vpack.c.bf16 %v1929_v47, %v1929_v47 }
 0x53c   : > { %3117 = vmatprep.subr.bf16.mxu1 %v3399_v3 }
 0x542   : > { %3108 = vmatmul.mubr.msk.bf16.vlgmr.msra.gmra.mxu1 %vm1610_vm0, %v1827_v45  ;;  %v3309_v45 = vld [vmem:[%s3640_s24 + $0x78] sm:$0xff]  }
 0x543   : > { %3118 = vmatpush3.bf16.msra.mxu1 %v3837_v5  ;;  %3119 = vmatprep.mubr.msk.bf16.mxu1 %vm3403_vm14, %v3399_v3  ;;  %v3280_v5 = vld [vmem:[%s4080_s20 + $0x20] sm:$0xff]  }
 0x544   : > { %3130 = vmatpush3.bf16.msra.mxu0 %v3280_v5  ;;  %2230 = vmatprep.subr.bf16.mxu1 %v3287_v27  ;;  %v2893_v5 = vld [vmem:[%s4082_s9] ss:$0 sm:$0xff] }
 0x545   : > { %3131 = vmatprep.subr.bf16.mxu0 %v3399_v3 }
 0x548   : > { %3132 = vmatpush3.bf16.msra.mxu0 %v3281_v50 }
 0x549   : > { %3133 = vmatprep.subr.bf16.mxu0 %v3399_v3 }
 0x54a   : > { %3120 = vmatmul.mubr.msk.bf16.vlgmr.msra.gmra.mxu1 %vm1610_vm0, %v1930_v34 }
 0x54b   : > { %2262 = vmatprep.mubr.bf16.mxu1 %v3402_v40  ;;  %v3283_v40 = vld [vmem:[%s4080_s20 + $0x8] sm:$0xff]   ;;  %2231 = vmatpush1.bf16.msra.mxu1 %v3285_v26 }
 0x54c   : > { %3134 = vmatpush3.bf16.msra.mxu0 %v3282_v51  ;;  %2232 = vmatprep.subr.bf16.mxu1 %v3290_v28  ;;  %v2894_v51 = vld [vmem:[%s4083_s3] ss:$0 sm:$0xff] }
 0x54d   : > { %3135 = vmatprep.subr.bf16.mxu0 %v3399_v3 }
 0x54f   : > { %2233 = vmatpush1.bf16.msra.mxu1 %v3288_v29 }
 0x550   : > { %3136 = vmatpush3.bf16.msra.mxu0 %v3283_v40  ;;  %2234 = vmatprep.subr.bf16.mxu1 %v3293_v35 }
 0x551   : > { %3137 = vmatprep.subr.bf16.mxu0 %v3399_v3 }
 0x553   : > { %2235 = vmatpush1.bf16.msra.mxu1 %v3291_v36 }
 0x554   : > { %3138 = vmatpush3.bf16.msra.mxu0 %v3284_v52  ;;  %2236 = vmatprep.subr.bf16.mxu1 %v3296_v37 }
 0x555   : > { %3024 = vmatprep.subr.bf16.mxu0 %v3309_v45 }
 0x557   : > { %2237 = vmatpush1.bf16.msra.mxu1 %v3294_v38 }
 0x558   : > { %2238 = vmatprep.subr.bf16.mxu1 %v3299_v39 }
 0x55b   : > { %2239 = vmatpush1.bf16.msra.mxu1 %v3297_v41 }
 0x55c   : > { %2240 = vmatprep.subr.bf16.mxu1 %v3302_v11 }
 0x55f   : > { %2241 = vmatpush1.bf16.msra.mxu1 %v3300_v42 }
 0x560   : > { %2242 = vmatprep.subr.bf16.mxu1 %v3305_v6 }
 0x563   : > { %2243 = vmatpush1.bf16.msra.mxu1 %v3303_v43 }
 0x564   : > { %2244 = vmatprep.subr.bf16.mxu1 %v3308_v44 }
 0x567   : > { %2245 = vmatpush1.bf16.msra.mxu1 %v3306_v33 }
 0x5f2   : > { %v1722_v53 = vpop.f32.mrf.mxu1 }
 0x5f4   : > { %v3091_v54 = vpop.f32.mrf.mxu1 }
 0x5f5   : > { %v3311_v54 = vld [vmem:[%s3640_s24 + $0x70] sm:$0xff]  }
 0x5f6   : > { %v1725_v55 = vpop.f32.mrf.mxu1 }
 0x5f7   : > { %v3312_v55 = vld [vmem:[%s3640_s24 + $0x30] sm:$0xff]  }
 0x5f8   : > { %v3092_v56 = vpop.f32.mrf.mxu1 }
 0x5f9   : > { %v3313_v56 = vld [vmem:[%s3640_s24 + $0x68] sm:$0xff]  }
 0x5fa   : > { %v1768_v57 = vpop.f32.mrf.mxu1 }
 0x5fb   : > { %v1769_v8 = vadd.f32 %v1768_v57, %v1722_v53  ;;  %v3314_v57 = vld [vmem:[%s3640_s24 + $0x28] sm:$0xff]  }
 0x5fc   : > { %v3097_v58 = vpop.f32.mrf.mxu1 }
 0x5fd   : > { %v3315_v58 = vld [vmem:[%s3640_s24 + $0x60] sm:$0xff]  }
 0x5fe   : > { %v1771_v59 = vpop.f32.mrf.mxu1 }
 0x5ff   : > { %v3316_v59 = vld [vmem:[%s3640_s24 + $0x20] sm:$0xff]  }
 0x600   : > { %v3098_v60 = vpop.f32.mrf.mxu1 }
 0x601   : > { %v3317_v60 = vld [vmem:[%s3640_s24 + $0x58] sm:$0xff]  }
 0x602   : > { %v1870_v62 = vpop.f32.mrf.mxu1 }
 0x603   : > { %v1876_v13 = vadd.f32 %v1870_v62, %v1769_v8  ;;  %v3318_v62 = vld [vmem:[%s3640_s24 + $0x18] sm:$0xff]   ;;  %v3321_v8 = vld [vmem:[%s3640_s24 + $0x48] sm:$0xff]  }
 0x604   : > { %v3109_v0 = vpop.f32.mrf.mxu1 }
 0x605   : > { %v3319_v0 = vld [vmem:[%s3640_s24 + $0x50] sm:$0xff]  }
 0x606   : > { %v1873_v1 = vpop.f32.mrf.mxu1 }
 0x607   : > { %v3320_v1 = vld [vmem:[%s3640_s24 + $0x10] sm:$0xff]  }
 0x608   : > { %v3110_v12 = vpop.f32.mrf.mxu1 }
 0x609   : > { %v3322_v12 = vld [vmem:[%s3640_s24 + $0x8] sm:$0xff]  }
 0x60a   : > { %v1973_v14 = vpop.f32.mrf.mxu1 }
 0x60b   : > { %v1979_v3 = vadd.f32 %v1973_v14, %v1876_v13  ;;  %v3323_v13 = vld [vmem:[%s3640_s24 + $0x40] sm:$0xff]  }
 0x60c   : > { %v3121_v15 = vpop.f32.mrf.mxu1  ;;  %v3324_v14 = vld [vmem:[%s3640_s24] sm:$0xff]  }
 0x60d   : > { %v1980_v16 = vpack.c.bf16 %v1979_v3, %v1979_v3  ;;  %v2138_v3 = vld [vmem:[%s3635_s17] sm:$0x3]  ;;  %s4085_s17 = sld [smem:[#allocation19_spill]] (!%p2928_p8) }
 0x60e   : > { %v1976_v17 = vpop.f32.mrf.mxu1  ;;  %v2143_v15 = vrot.slane %v2138_v3, %v1344_v63 }
 0x60f   : > { %3140 = vmatmul.mubr.bf16.vlgmr.msra.gmra.mxu0 %v1980_v16  ;;  %v2147_v16 = vrot.slane %v2138_v3, %v1348_v61 }
 0x610   : > { %v3122_v19 = vpop.f32.mrf.mxu1  ;;  %3025 = vmatpush3.bf16.msra.mxu0 %v3310_v46 }
 0x611   : > { %3026 = vmatprep.subr.bf16.mxu0 %v3311_v54 }
 0x614   : > { %3027 = vmatpush3.bf16.msra.mxu0 %v3312_v55 }
 0x615   : > { %3028 = vmatprep.subr.bf16.mxu0 %v3313_v56 }
 0x618   : > { %3029 = vmatpush3.bf16.msra.mxu0 %v3314_v57 }
 0x619   : > { %3030 = vmatprep.subr.bf16.mxu0 %v3315_v58 }
 0x61c   : > { %3031 = vmatpush3.bf16.msra.mxu0 %v3316_v59 }
 0x61d   : > { %3032 = vmatprep.subr.bf16.mxu0 %v3317_v60 }
 0x620   : > { %3033 = vmatpush3.bf16.msra.mxu0 %v3318_v62 }
 0x621   : > { %3034 = vmatprep.subr.bf16.mxu0 %v3319_v0 }
 0x624   : > { %3035 = vmatpush3.bf16.msra.mxu0 %v3320_v1 }
 0x625   : > { %3036 = vmatprep.subr.bf16.mxu0 %v3321_v8 }
 0x628   : > { %3037 = vmatpush3.bf16.msra.mxu0 %v3322_v12 }
 0x629   : > { %3038 = vmatprep.subr.bf16.mxu0 %v3323_v13 }
 0x62c   : > { %3039 = vmatpush3.bf16.msra.mxu0 %v3324_v14 }
 0x6cf   : > { %v2086_v21 = vpop.f32.mrf.mxu0 }
 0x6d0   : > { %v2087_v22 = vadd.f32 %v2884_v20, %v2086_v21 }
 0x6d1   : > { %v3141_v23 = vpop.f32.mrf.mxu0 }
 0x6d2   : > { %v3905_v9 = vadd.f32 %v2087_v22, %v3761_v18 }
 0x6d3   : > { %v2089_v24 = vpop.f32.mrf.mxu0 }
 0x6d4   : > { %2095 = vadd.xlane.f32.xlu0 %v3905_v9 }
 0x6d5   : > { %v3142_v25 = vpop.f32.mrf.mxu0 }
 0x75d   : > { %v2096_v18 = vpop.xlane.xlu0 %2095 }
 0x75e   : > { %v2097_v30 = vmul.f32 0.015625, %v2096_v18 }
 0x760   : > { %v2098_v31 = vsub.f32 %v3905_v9, %v2097_v30 }
 0x762   : > { %v2099_v32 = vmul.f32 %v3570_v4, %v2098_v31 }
 0x764   : > { %v2100_v7 = vmul.f32 %v2099_v32, %v2099_v32 }
 0x766   : > { %2101 = vadd.xlane.f32.xlu1 %v2100_v7  ;;  %v2911_v7 = vld [vmem:[%s860_s28] ss:$0 sm:$0xff] }
 0x7ef   : > { %v2102_v47 = vpop.xlane.xlu1 %2101 }
 0x7f0   : > { %v2103_v34 = vmul.f32 0.015625, %v2102_v47 }
 0x7f2   : > { %v2104_v48 = vadd.f32 1e-05, %v2103_v34 }
 0x7f4   : > { %3343 = vrsqrt.f32 %v2104_v48 }
 0x801   : > { %v3344_v49 = vpop.eup %3343 }
 0x802   : > { %v2106_v50 = vmul.f32 %v3344_v49, %v2099_v32 }
 0x804   : > { %v2113_v40 = vmul.f32 %v2893_v5, %v2106_v50 }
 0x806   : > { %v2120_v52 = vadd.f32 %v2894_v51, %v2113_v40 }
 0x808   : > { %v2121_v53 = vpack.c.bf16 %v2120_v52, %v2120_v52 }
 0x80a   : > { %2263 = vmatmul.mubr.bf16.vlgmr.msra.gmra.mxu1 %v2121_v53 }
 0x8ca   : > { %v2264_v17 = vpop.f32.mrf.mxu1 }
 0x8cb   : > { %v2265_v19 = vadd.f32 %v2264_v17, %v2143_v15 }
 0x8cc   : > { %v2266_v20 = vpop.f32.mrf.mxu1 }
 0x8cd   : > { %v2273_v21 = vmul.f32 0.70710677, %v2265_v19  ;;  %v2267_v22 = vadd.f32 %v2266_v20, %v2147_v16  ;;  %v2271_v29 = vmul.f32 0.5, %v2265_v19 }
 0x8ce   : > { %v2268_v23 = vpop.f32.mrf.mxu1 }
 0x8cf   : > { %3345 = verf.f32 %v2273_v21  ;;  %v2274_v24 = vmul.f32 0.70710677, %v2267_v22  ;;  %v2272_v18 = vmul.f32 0.5, %v2267_v22 }
 0x8d0   : > { %v2269_v25 = vpop.f32.mrf.mxu1 }
 0x8d1   : > { %3347 = verf.f32 %v2274_v24 }
 0x8dc   : > { %v3346_v26 = vpop.eup %3345 }
 0x8dd   : > { %v2277_v27 = vadd.f32 1.0, %v3346_v26 }
 0x8de   : > { %v3348_v28 = vpop.eup %3347 }
 0x8df   : > { %v2278_v63 = vadd.f32 1.0, %v3348_v28  ;;  %v2279_v30 = vmul.f32 %v2277_v27, %v2271_v29 }
 0x8e1   : > { %v2280_v2 = vmul.f32 %v2278_v63, %v2272_v18  ;;  %v2281_v31 = vpack.c.bf16 %v2279_v30, %v2279_v30 }
 0x8e3   : > { %v2282_v61 = vpack.c.bf16 %v2280_v2, %v2280_v2 }
 0x8e5   : > { %2450 = vmatprep.mubr.bf16.mxu0 %v2282_v61 }
 0x8e6   : > { %2451 = vmatmul.mubr.bf16.vlgmr.msra.gmra.mxu0 %v2281_v31 }
 0x9a6   : > { %v3040_v32 = vpop.f32.mrf.mxu0 }
 0x9a8   : > { %v3041_v35 = vpop.f32.mrf.mxu0 }
 0x9a9   : > { %v3042_v36 = vadd.f32 %v3041_v35, %v3040_v32 }
 0x9aa   : > { %v3043_v37 = vpop.f32.mrf.mxu0 }
 0x9ab   : > { %v2453_v38 = vadd.f32 %v3042_v36, %v2911_v7 }
 0x9ac   : > { %v3044_v39 = vpop.f32.mrf.mxu0 }
 0x9ad   : > { %v2458_v41 = vadd.f32 %v2453_v38, %v3905_v9  ;;  %2464 = sbr.rel (%p2928_p8) target bundleno = 2993 (0xbb1), region = 112 }
 0x9af   : > { %v2459_v11 = vmul.f32 %v3593_v10, %v2458_v41 }
 0x9b1   : > { %2460 = vst [vmem:[#allocation2] sm:$0xff] %v2459_v11 }
 0x9b2   : > { %vm2465_vm1 = vcmask 1040384   ;;  %v3349_v6 = vld [vmem:[%s4084_s0 + $0x38] sm:$0xff]   ;;  %v3404_v43 = vmov 0.0   ;;  %v3350_v9 = vld [vmem:[%s4084_s0 + $0x30] sm:$0xff]   ;;  %v3351_v47 = vld [vmem:[%s4084_s0 + $0x28] sm:$0xff]   ;;  %vm3405_vm2 = vmmov 0  }
 0x9b3   : > { %v2466_v42 = vsel %vm2465_vm1, %v2459_v11, 0.0  ;;  %3143 = vmatprep.subr.bf16.mxu0 %v3404_v43  ;;  %v3352_v34 = vld [vmem:[%s4084_s0 + $0x20] sm:$0xff]   ;;  %3159 = vmatprep.mubr.msk.bf16.mxu0 %vm3405_vm2, %v3404_v43  ;;  %v3353_v48 = vld [vmem:[%s4084_s0 + $0x18] sm:$0xff]   ;;  %v3355_v49 = vld [vmem:[%s4084_s0 + $0x8] sm:$0xff]  }
 0x9b4   : > { %2469 = vadd.xlane.f32.xlu0 %v2466_v42  ;;  %3144 = vmatpush3.bf16.msra.mxu0 %v3349_v6  ;;  %v3356_v5 = vld [vmem:[%s4084_s0] sm:$0xff]  }
 0x9b5   : > { %3145 = vmatprep.subr.bf16.mxu0 %v3404_v43  ;;  %v2929_v53 = vld [vmem:[%s4085_s17] ss:$0 sm:$0xff] }
 0x9b6   : > { %v2930_v55 = vld [vmem:[%s4086_s1] ss:$0 sm:$0xff] }
 0x9b7   : > { %v2931_v59 = vld [vmem:[%s4087_s2] ss:$0 sm:$0xff] }
 0x9b8   : > { %3146 = vmatpush3.bf16.msra.mxu0 %v3350_v9 }
 0x9b9   : > { %3147 = vmatprep.subr.bf16.mxu0 %v3404_v43 }
 0x9bc   : > { %3148 = vmatpush3.bf16.msra.mxu0 %v3351_v47 }
 0x9bd   : > { %3149 = vmatprep.subr.bf16.mxu0 %v3404_v43 }
 0x9c0   : > { %3150 = vmatpush3.bf16.msra.mxu0 %v3352_v34 }
 0x9c1   : > { %3151 = vmatprep.subr.bf16.mxu0 %v3404_v43 }
 0x9c4   : > { %3152 = vmatpush3.bf16.msra.mxu0 %v3353_v48 }
 0x9c5   : > { %3153 = vmatprep.subr.bf16.mxu0 %v3404_v43 }
 0xa3d   : > { %v2470_v10 = vpop.xlane.xlu0 %2469 }
 0xa3e   : > { %v2471_v44 = vmul.f32 0.015625, %v2470_v10 }
 0xa40   : > { %v2472_v33 = vsub.f32 %v2466_v42, %v2471_v44 }
 0xa42   : > { %v2473_v45 = vmul.f32 %v3570_v4, %v2472_v33  ;;  %v3354_v4 = vld [vmem:[%s4084_s0 + $0x10] sm:$0xff]  }
 0xa43   : > { %3154 = vmatpush3.bf16.msra.mxu0 %v3354_v4 }
 0xa44   : > { %v2474_v46 = vmul.f32 %v2473_v45, %v2473_v45  ;;  %3155 = vmatprep.subr.bf16.mxu0 %v3404_v43 }
 0xa46   : > { %2475 = vadd.xlane.f32.xlu0 %v2474_v46 }
 0xa47   : > { %3156 = vmatpush3.bf16.msra.mxu0 %v3355_v49 }
 0xa48   : > { %3157 = vmatprep.subr.bf16.mxu0 %v3404_v43 }
 0xa4b   : > { %3158 = vmatpush3.bf16.msra.mxu0 %v3356_v5 }
 0xacf   : > { %v2476_v50 = vpop.xlane.xlu0 %2475 }
 0xad0   : > { %v2477_v51 = vmul.f32 0.015625, %v2476_v50 }
 0xad2   : > { %v2478_v40 = vadd.f32 1e-05, %v2477_v51 }
 0xad4   : > { %3357 = vrsqrt.f32 %v2478_v40 }
 0xae1   : > { %v3358_v52 = vpop.eup %3357 }
 0xae2   : > { %v2480_v54 = vmul.f32 %v3358_v52, %v2473_v45 }
 0xae4   : > { %v2487_v56 = vmul.f32 %v2929_v53, %v2480_v54 }
 0xae6   : > { %v2494_v57 = vadd.f32 %v2930_v55, %v2487_v56 }
 0xae8   : > { %v2495_v58 = vpack.c.bf16 %v2494_v57, %v2494_v57 }
 0xaea   : > { %3160 = vmatmul.mubr.bf16.vlgmr.msra.gmra.mxu0 %v2495_v58 }
 0xbaa   : > { %v2601_v60 = vpop.f32.mrf.mxu0 }
 0xbab   : > { %v2602_v62 = vadd.f32 %v2931_v59, %v2601_v60 }
 0xbac   : > { %v3161_v0 = vpop.f32.mrf.mxu0 }
 0xbad   : > { %2607 = vst [vmem:[%s3651_s6] sm:$0xff] %v2602_v62 }
 0xbae   : > { %v2604_v1 = vpop.f32.mrf.mxu0 }
 0xbb0   : > { %v3162_v8 = vpop.f32.mrf.mxu0 }
 0xbb1 PF: > { %s4088_s18 = sld [smem:[#allocation5_spill]] }
 0xbb2   : > { %s4089_s2 = sld [smem:[#allocation3_spill]] }
 0xbb3   : > { %s4090_s25 = sld [smem:[#allocation4_spill]] }
 0xbb4   : > { %s4091_s26 = sld [smem:[#allocation6_spill]] }
 0xbb5   : > { %s4092_s27 = sld [smem:[#allocation7_spill]] }
 0xbb7   : > { %s31_s3 = sadd.s32 1, %s4088_s18  }
 0xbb8   : > { %p28_p9 = scmp.ge.s32.totalorder %s31_s3, 6  }
 0xbba   :  { %30 = sbr.rel (!%p28_p9) target bundleno = 15 (0xf), region = 178 }

</bundles_post_ra>
